<compile_context>
chip_gen: v7x
topology: tpu7x:2x2x1
jax: 0.10.0
libtpu: 0.0.40
codegen_flags: <defaults>
</compile_context>

<pallas_src>
import functools
import math

import jax
import jax.numpy as jnp
from jax.experimental import pallas as pl
from jax.experimental.pallas import tpu as pltpu

# ---------------- model dims (small, consistent with the module) ----------------
B = 2          # batch
T = 8          # target (decoder) sequence length
S = 8          # source (memory) sequence length
D_MODEL = 32   # d_model
N_HEADS = 4    # num_heads
HEAD_DIM = D_MODEL // N_HEADS
D_FF = 64      # d_ff
LN_EPS = 1e-5
SCALE = 1.0 / math.sqrt(HEAD_DIM)
MASK_NEG = -1e30   # additive mask bias (large finite negative -> no NaN on all-masked rows)


# ---------------------------------- kernel ----------------------------------
def _decoder_layer_kernel(
    x_ref, mem_ref, tbias_ref, sbias_ref,
    wqkv1_ref, wo1_ref,
    wq2_ref, wkv2_ref, wo2_ref,
    w1_ref, b1_ref, w2_ref, b2_ref,
    g1_ref, be1_ref, g2_ref, be2_ref, g3_ref, be3_ref,
    o_ref,
    *, num_heads, head_dim, scale,
):
  H = num_heads
  hd = head_dim
  D = H * hd

  x = x_ref[0].astype(jnp.float32)        # (T, D)
  mem = mem_ref[0].astype(jnp.float32)    # (S, D)
  tbias = tbias_ref[...]                  # (T, T) additive bias (0 / MASK_NEG)
  sbias = sbias_ref[...]                  # (T, S)

  def split_heads(y, n):
    # (L, n*D) f32 -> (n*H, L, hd) bf16, head-major, ready for batched dots.
    L = y.shape[0]
    y3 = jnp.transpose(y.reshape(L, n * H, hd), (1, 0, 2))
    return y3.astype(jnp.bfloat16)

  def attention(q3, k3, v3, bias, wo):
    # q3: (H, Tq, hd) bf16, k3/v3: (H, Tk, hd) bf16, bias: (Tq, Tk) f32, wo: (D, D) bf16.
    # scores = einsum('hqd,hkd->hqk'): contracts hd, no explicit K transpose materialized.
    scores = jax.lax.dot_general(
        q3, k3, (((2,), (2,)), ((0,), (0,))),
        preferred_element_type=jnp.float32)                 # (H, Tq, Tk) f32
    scores = scores * scale + bias[None, :, :]
    m = jnp.max(scores, axis=-1, keepdims=True)
    p = jnp.exp(scores - m)
    denom = jnp.sum(p, axis=-1, keepdims=True)
    attn = p * pl.reciprocal(denom, approx=True)            # EUP reciprocal + VPU mul
    # ctx = einsum('hqk,hkd->hqd')
    ctx = jax.lax.dot_general(
        attn.astype(jnp.bfloat16), v3, (((2,), (1,)), ((0,), (0,))),
        preferred_element_type=jnp.float32)                 # (H, Tq, hd) f32
    tq = ctx.shape[1]
    ctx = jnp.transpose(ctx, (1, 0, 2)).reshape(tq, D)      # concat heads -> (Tq, D)
    # Single output projection on concatenated heads.
    return jnp.dot(ctx.astype(jnp.bfloat16), wo, preferred_element_type=jnp.float32)

  def layernorm(v, g, b):
    mu = jnp.mean(v, axis=-1, keepdims=True)
    var = jnp.mean((v - mu) ** 2, axis=-1, keepdims=True)
    return (v - mu) * jax.lax.rsqrt(var + LN_EPS) * g + b

  # Affine / bias params loaded once (all (1, D) / (1, D_ff) f32), reused below.
  g1 = g1_ref[...]; be1 = be1_ref[...]
  g2 = g2_ref[...]; be2 = be2_ref[...]
  g3 = g3_ref[...]; be3 = be3_ref[...]
  b1 = b1_ref[...]; b2 = b2_ref[...]

  # ---- 1) masked self-attention (fused QKV projection) + add & norm ----
  qkv = jnp.dot(x.astype(jnp.bfloat16), wqkv1_ref[...],
                preferred_element_type=jnp.float32)         # (T, 3D) f32
  heads = split_heads(qkv, 3)                               # (3H, T, hd) bf16
  attn1 = attention(heads[:H], heads[H:2 * H], heads[2 * H:], tbias, wo1_ref[...])
  x1 = layernorm(x + attn1, g1, be1)

  # ---- 2) encoder-decoder attention (fused KV projection) + add & norm ----
  q2 = jnp.dot(x1.astype(jnp.bfloat16), wq2_ref[...],
               preferred_element_type=jnp.float32)          # (T, D) f32
  kv2 = jnp.dot(mem.astype(jnp.bfloat16), wkv2_ref[...],
                preferred_element_type=jnp.float32)         # (S, 2D) f32
  q3 = split_heads(q2, 1)                                   # (H, T, hd)
  kvh = split_heads(kv2, 2)                                 # (2H, S, hd)
  attn2 = attention(q3, kvh[:H], kvh[H:], sbias, wo2_ref[...])
  x2 = layernorm(x1 + attn2, g2, be2)

  # ---- 3) position-wise feed-forward + add & norm ----
  h = jnp.dot(x2.astype(jnp.bfloat16), w1_ref[...],
              preferred_element_type=jnp.float32) + b1      # (T, D_ff) f32
  h = jnp.maximum(h, 0.0)
  ff = jnp.dot(h.astype(jnp.bfloat16), w2_ref[...],
               preferred_element_type=jnp.float32) + b2     # (T, D) f32
  x3 = layernorm(x2 + ff, g3, be3)

  o_ref[0] = x3.astype(o_ref.dtype)


# --------------------------------- wrapper ----------------------------------
def decoder_layer(x, memory, tgt_mask, src_mask, params):
  """x: (B,T,D) f32, memory: (B,S,D) f32, masks: (T,T)/(T,S) float (1=allowed, 0=masked)."""
  (wq1, wk1, wv1, wo1, wq2, wk2, wv2, wo2,
   w1, b1, w2, b2, g1, be1, g2, be2, g3, be3) = params
  Bb, Tt, Dd = x.shape
  Ss = memory.shape[1]
  bf16 = jnp.bfloat16

  # One-time wrapper-side preprocessing: fuse QKV / KV weights, cast MXU operands to bf16,
  # and turn the boolean-style masks into additive biases (hoisted out of the kernel).
  fused = [
      jnp.concatenate([wq1, wk1, wv1], axis=1).astype(bf16),   # wqkv1: (D, 3D)
      wo1.astype(bf16),                                        # (D, D)
      wq2.astype(bf16),                                        # (D, D)
      jnp.concatenate([wk2, wv2], axis=1).astype(bf16),        # wkv2:  (D, 2D)
      wo2.astype(bf16),                                        # (D, D)
      w1.astype(bf16), b1,                                     # (D, Dff), (1, Dff)
      w2.astype(bf16), b2,                                     # (Dff, D), (1, D)
      g1, be1, g2, be2, g3, be3,                               # layernorm affine, (1, D) f32
  ]
  tgt_bias = jnp.where(tgt_mask > 0.5, 0.0, MASK_NEG).astype(jnp.float32)
  src_bias = jnp.where(src_mask > 0.5, 0.0, MASK_NEG).astype(jnp.float32)

  in_specs = [
      pl.BlockSpec((1, Tt, Dd), lambda b: (b, 0, 0)),   # x: one batch per grid step
      pl.BlockSpec((1, Ss, Dd), lambda b: (b, 0, 0)),   # memory
      pl.BlockSpec((Tt, Tt), lambda b: (0, 0)),         # additive tgt bias (shared)
      pl.BlockSpec((Tt, Ss), lambda b: (0, 0)),         # additive src bias (shared)
  ] + [pl.BlockSpec(p.shape, lambda b: (0, 0)) for p in fused]

  kernel = functools.partial(
      _decoder_layer_kernel,
      num_heads=N_HEADS, head_dim=HEAD_DIM, scale=SCALE)

  return pl.pallas_call(
      kernel,
      out_shape=jax.ShapeDtypeStruct((Bb, Tt, Dd), jnp.float32),
      grid_spec=pltpu.PrefetchScalarGridSpec(
          num_scalar_prefetch=0,
          grid=(Bb,),
          in_specs=in_specs,
          out_specs=pl.BlockSpec((1, Tt, Dd), lambda b: (b, 0, 0)),
      ),
      # Batch axis is independent -> "parallel": with B=2 this keeps both v7x TensorCores
      # busy (one batch per core); on v5e/v6e it is just a 2-step sequential loop.
      compiler_params=pltpu.CompilerParams(
          dimension_semantics=("parallel",)),
  )(x, memory, tgt_bias, src_bias, *fused)


# --------------------------- pure-JAX reference ------------------------------
def _mm(a, w):
  # Emulate the kernel's MXU numerics: bf16 operands, f32 accumulation.
  return jnp.matmul(a.astype(jnp.bfloat16), w.astype(jnp.bfloat16),
                    preferred_element_type=jnp.float32)


def _ref_mha(q_in, kv_in, wq, wk, wv, wo, bias):
  Bb, Tq, Dd = q_in.shape
  Tk = kv_in.shape[1]
  Q = _mm(q_in, wq).reshape(Bb, Tq, N_HEADS, HEAD_DIM).transpose(0, 2, 1, 3)
  K = _mm(kv_in, wk).reshape(Bb, Tk, N_HEADS, HEAD_DIM).transpose(0, 2, 1, 3)
  V = _mm(kv_in, wv).reshape(Bb, Tk, N_HEADS, HEAD_DIM).transpose(0, 2, 1, 3)
  scores = jnp.einsum('bhqd,bhkd->bhqk', Q.astype(jnp.bfloat16), K.astype(jnp.bfloat16),
                      preferred_element_type=jnp.float32) * SCALE + bias[None, None]
  attn = jax.nn.softmax(scores, axis=-1)
  ctx = jnp.einsum('bhqk,bhkd->bhqd', attn.astype(jnp.bfloat16), V.astype(jnp.bfloat16),
                   preferred_element_type=jnp.float32)
  ctx = ctx.transpose(0, 2, 1, 3).reshape(Bb, Tq, Dd)
  return _mm(ctx, wo)


def _ref_ln(v, g, b):
  mu = jnp.mean(v, axis=-1, keepdims=True)
  var = jnp.mean((v - mu) ** 2, axis=-1, keepdims=True)
  return (v - mu) * jax.lax.rsqrt(var + LN_EPS) * g + b


def decoder_layer_ref(x, memory, tgt_bias, src_bias, p):
  (wq1, wk1, wv1, wo1, wq2, wk2, wv2, wo2,
   w1, b1, w2, b2, g1, be1, g2, be2, g3, be3) = p
  a1 = _ref_mha(x, x, wq1, wk1, wv1, wo1, tgt_bias)
  x1 = _ref_ln(x + a1, g1, be1)
  a2 = _ref_mha(x1, memory, wq2, wk2, wv2, wo2, src_bias)
  x2 = _ref_ln(x1 + a2, g2, be2)
  h = jnp.maximum(_mm(x2, w1) + b1, 0.0)
  ff = _mm(h, w2) + b2
  return _ref_ln(x2 + ff, g3, be3)


# ----------------------------------- main ------------------------------------
if __name__ == "__main__":
  key = jax.random.PRNGKey(0)
  keys = jax.random.split(key, 16)

  x = jax.random.normal(keys[0], (B, T, D_MODEL), jnp.float32)
  memory = jax.random.normal(keys[1], (B, S, D_MODEL), jnp.float32)

  # causal target mask, full source mask (float: 1 allowed / 0 masked)
  tgt_mask = jnp.tril(jnp.ones((T, T), jnp.float32))
  src_mask = jnp.ones((T, S), jnp.float32)

  def lin(k, fan_in, fan_out):
    bound = 1.0 / math.sqrt(fan_in)
    return jax.random.uniform(k, (fan_in, fan_out), jnp.float32, -bound, bound)

  # deterministic parameter init (weights stored as (in, out))
  wq1 = lin(keys[2], D_MODEL, D_MODEL)
  wk1 = lin(keys[3], D_MODEL, D_MODEL)
  wv1 = lin(keys[4], D_MODEL, D_MODEL)
  wo1 = lin(keys[5], D_MODEL, D_MODEL)
  wq2 = lin(keys[6], D_MODEL, D_MODEL)
  wk2 = lin(keys[7], D_MODEL, D_MODEL)
  wv2 = lin(keys[8], D_MODEL, D_MODEL)
  wo2 = lin(keys[9], D_MODEL, D_MODEL)
  w1 = lin(keys[10], D_MODEL, D_FF)
  b1 = jax.random.uniform(keys[11], (1, D_FF), jnp.float32,
                          -1.0 / math.sqrt(D_MODEL), 1.0 / math.sqrt(D_MODEL))
  w2 = lin(keys[12], D_FF, D_MODEL)
  b2 = jax.random.uniform(keys[13], (1, D_MODEL), jnp.float32,
                          -1.0 / math.sqrt(D_FF), 1.0 / math.sqrt(D_FF))
  g1 = jnp.ones((1, D_MODEL), jnp.float32);  be1 = jnp.zeros((1, D_MODEL), jnp.float32)
  g2 = jnp.ones((1, D_MODEL), jnp.float32);  be2 = jnp.zeros((1, D_MODEL), jnp.float32)
  g3 = jnp.ones((1, D_MODEL), jnp.float32);  be3 = jnp.zeros((1, D_MODEL), jnp.float32)
  # make layernorm affine params non-trivial but deterministic
  g2 = g2 * 1.1
  be3 = be3 + 0.05

  params = [wq1, wk1, wv1, wo1, wq2, wk2, wv2, wo2,
            w1, b1, w2, b2, g1, be1, g2, be2, g3, be3]

  out = decoder_layer(x, memory, tgt_mask, src_mask, params)
  out = jax.block_until_ready(out)

  tgt_bias = jnp.where(tgt_mask > 0.5, 0.0, MASK_NEG).astype(jnp.float32)
  src_bias = jnp.where(src_mask > 0.5, 0.0, MASK_NEG).astype(jnp.float32)
  ref = decoder_layer_ref(x, memory, tgt_bias, src_bias, params)

  assert out.shape == (B, T, D_MODEL)
  max_err = jnp.max(jnp.abs(out - ref))
  # Reference emulates the kernel's bf16-MXU / f32-accumulate numerics; remaining delta comes
  # from the approximate EUP reciprocal and accumulation-order differences.
  assert jnp.allclose(out, ref, atol=2e-2, rtol=2e-2), \
      f"mismatch: max abs err = {max_err}"

  print("KERNEL_OK")
</pallas_src>

<mosaic_0001>
module attributes {stable_mosaic.version = 11 : i64} {
  func.func @_decoder_layer_kernel(%arg0: i32, %arg1: memref<1x8x32xf32, #tpu.memory_space<vmem>>, %arg2: memref<1x8x32xf32, #tpu.memory_space<vmem>>, %arg3: memref<8x8xf32, #tpu.memory_space<vmem>>, %arg4: memref<8x8xf32, #tpu.memory_space<vmem>>, %arg5: memref<32x96xbf16, #tpu.memory_space<vmem>>, %arg6: memref<32x32xbf16, #tpu.memory_space<vmem>>, %arg7: memref<32x32xbf16, #tpu.memory_space<vmem>>, %arg8: memref<32x64xbf16, #tpu.memory_space<vmem>>, %arg9: memref<32x32xbf16, #tpu.memory_space<vmem>>, %arg10: memref<32x64xbf16, #tpu.memory_space<vmem>>, %arg11: memref<1x64xf32, #tpu.memory_space<vmem>>, %arg12: memref<64x32xbf16, #tpu.memory_space<vmem>>, %arg13: memref<1x32xf32, #tpu.memory_space<vmem>>, %arg14: memref<1x32xf32, #tpu.memory_space<vmem>>, %arg15: memref<1x32xf32, #tpu.memory_space<vmem>>, %arg16: memref<1x32xf32, #tpu.memory_space<vmem>>, %arg17: memref<1x32xf32, #tpu.memory_space<vmem>>, %arg18: memref<1x32xf32, #tpu.memory_space<vmem>>, %arg19: memref<1x32xf32, #tpu.memory_space<vmem>>, %arg20: memref<1x8x32xf32, #tpu.memory_space<vmem>>) attributes {dimension_semantics = [#tpu.dimension_semantics<parallel>], iteration_bounds = array<i64: 2>, scalar_prefetch = 0 : i64, scratch_operands = 0 : i64, tpu.core_type = #tpu.core_type<tc>, window_params = [{transform_indices = @transform_0, window_bounds = array<i64: 1, 8, 32>}, {transform_indices = @transform_1, window_bounds = array<i64: 1, 8, 32>}, {pipeline_mode = #tpu.pipeline_mode<synchronous>, transform_indices = @transform_2, window_bounds = array<i64: 8, 8>}, {pipeline_mode = #tpu.pipeline_mode<synchronous>, transform_indices = @transform_3, window_bounds = array<i64: 8, 8>}, {pipeline_mode = #tpu.pipeline_mode<synchronous>, transform_indices = @transform_4, window_bounds = array<i64: 32, 96>}, {pipeline_mode = #tpu.pipeline_mode<synchronous>, transform_indices = @transform_5, window_bounds = array<i64: 32, 32>}, {pipeline_mode = #tpu.pipeline_mode<synchronous>, transform_indices = @transform_6, window_bounds = array<i64: 32, 32>}, {pipeline_mode = #tpu.pipeline_mode<synchronous>, transform_indices = @transform_7, window_bounds = array<i64: 32, 64>}, {pipeline_mode = #tpu.pipeline_mode<synchronous>, transform_indices = @transform_8, window_bounds = array<i64: 32, 32>}, {pipeline_mode = #tpu.pipeline_mode<synchronous>, transform_indices = @transform_9, window_bounds = array<i64: 32, 64>}, {pipeline_mode = #tpu.pipeline_mode<synchronous>, transform_indices = @transform_10, window_bounds = array<i64: 1, 64>}, {pipeline_mode = #tpu.pipeline_mode<synchronous>, transform_indices = @transform_11, window_bounds = array<i64: 64, 32>}, {pipeline_mode = #tpu.pipeline_mode<synchronous>, transform_indices = @transform_12, window_bounds = array<i64: 1, 32>}, {pipeline_mode = #tpu.pipeline_mode<synchronous>, transform_indices = @transform_13, window_bounds = array<i64: 1, 32>}, {pipeline_mode = #tpu.pipeline_mode<synchronous>, transform_indices = @transform_14, window_bounds = array<i64: 1, 32>}, {pipeline_mode = #tpu.pipeline_mode<synchronous>, transform_indices = @transform_15, window_bounds = array<i64: 1, 32>}, {pipeline_mode = #tpu.pipeline_mode<synchronous>, transform_indices = @transform_16, window_bounds = array<i64: 1, 32>}, {pipeline_mode = #tpu.pipeline_mode<synchronous>, transform_indices = @transform_17, window_bounds = array<i64: 1, 32>}, {pipeline_mode = #tpu.pipeline_mode<synchronous>, transform_indices = @transform_18, window_bounds = array<i64: 1, 32>}, {transform_indices = @transform_19, window_bounds = array<i64: 1, 8, 32>}]} {
    %c0 = arith.constant 0 : index
    %c0_0 = arith.constant 0 : index
    %c0_1 = arith.constant 0 : index
    %0 = vector.load %arg1[%c0, %c0_0, %c0_1] : memref<1x8x32xf32, #tpu.memory_space<vmem>>, vector<1x8x32xf32>
    %1 = vector.shape_cast %0 : vector<1x8x32xf32> to vector<8x32xf32>
    %c0_2 = arith.constant 0 : index
    %c0_3 = arith.constant 0 : index
    %c0_4 = arith.constant 0 : index
    %2 = vector.load %arg2[%c0_2, %c0_3, %c0_4] : memref<1x8x32xf32, #tpu.memory_space<vmem>>, vector<1x8x32xf32>
    %3 = vector.shape_cast %2 : vector<1x8x32xf32> to vector<8x32xf32>
    %c0_5 = arith.constant 0 : index
    %c0_6 = arith.constant 0 : index
    %4 = vector.load %arg3[%c0_5, %c0_6] : memref<8x8xf32, #tpu.memory_space<vmem>>, vector<8x8xf32>
    %c0_7 = arith.constant 0 : index
    %c0_8 = arith.constant 0 : index
    %5 = vector.load %arg4[%c0_7, %c0_8] : memref<8x8xf32, #tpu.memory_space<vmem>>, vector<8x8xf32>
    %c0_9 = arith.constant 0 : index
    %c0_10 = arith.constant 0 : index
    %6 = vector.load %arg14[%c0_9, %c0_10] : memref<1x32xf32, #tpu.memory_space<vmem>>, vector<1x32xf32>
    %c0_11 = arith.constant 0 : index
    %c0_12 = arith.constant 0 : index
    %7 = vector.load %arg15[%c0_11, %c0_12] : memref<1x32xf32, #tpu.memory_space<vmem>>, vector<1x32xf32>
    %c0_13 = arith.constant 0 : index
    %c0_14 = arith.constant 0 : index
    %8 = vector.load %arg16[%c0_13, %c0_14] : memref<1x32xf32, #tpu.memory_space<vmem>>, vector<1x32xf32>
    %c0_15 = arith.constant 0 : index
    %c0_16 = arith.constant 0 : index
    %9 = vector.load %arg17[%c0_15, %c0_16] : memref<1x32xf32, #tpu.memory_space<vmem>>, vector<1x32xf32>
    %c0_17 = arith.constant 0 : index
    %c0_18 = arith.constant 0 : index
    %10 = vector.load %arg18[%c0_17, %c0_18] : memref<1x32xf32, #tpu.memory_space<vmem>>, vector<1x32xf32>
    %c0_19 = arith.constant 0 : index
    %c0_20 = arith.constant 0 : index
    %11 = vector.load %arg19[%c0_19, %c0_20] : memref<1x32xf32, #tpu.memory_space<vmem>>, vector<1x32xf32>
    %c0_21 = arith.constant 0 : index
    %c0_22 = arith.constant 0 : index
    %12 = vector.load %arg11[%c0_21, %c0_22] : memref<1x64xf32, #tpu.memory_space<vmem>>, vector<1x64xf32>
    %c0_23 = arith.constant 0 : index
    %c0_24 = arith.constant 0 : index
    %13 = vector.load %arg13[%c0_23, %c0_24] : memref<1x32xf32, #tpu.memory_space<vmem>>, vector<1x32xf32>
    %14 = arith.truncf %1 : vector<8x32xf32> to vector<8x32xbf16>
    %c0_25 = arith.constant 0 : index
    %c0_26 = arith.constant 0 : index
    %15 = vector.load %arg5[%c0_25, %c0_26] : memref<32x96xbf16, #tpu.memory_space<vmem>>, vector<32x96xbf16>
    %cst = arith.constant dense<0.000000e+00> : vector<8x96xf32>
    %16 = tpu.matmul %14, %15, %cst {dimension_numbers = #tpu.dot_dimension_numbers<[1], [0], [0], [1], [0, 0, 1, 1], [], []>} : vector<8x32xbf16>, vector<32x96xbf16>, vector<8x96xf32> -> vector<8x96xf32>
    %17 = vector.shape_cast %16 : vector<8x96xf32> to vector<8x12x8xf32>
    %18 = tpu.transpose %17, [1, 0, 2] : vector<8x12x8xf32> -> vector<12x8x8xf32>
    %19 = arith.truncf %18 : vector<12x8x8xf32> to vector<12x8x8xbf16>
    %20 = vector.extract_strided_slice %19 {offsets = [0, 0, 0], sizes = [4, 8, 8], strides = [1, 1, 1]} : vector<12x8x8xbf16> to vector<4x8x8xbf16>
    %21 = vector.extract_strided_slice %19 {offsets = [4, 0, 0], sizes = [4, 8, 8], strides = [1, 1, 1]} : vector<12x8x8xbf16> to vector<4x8x8xbf16>
    %22 = vector.extract_strided_slice %19 {offsets = [8, 0, 0], sizes = [4, 8, 8], strides = [1, 1, 1]} : vector<12x8x8xbf16> to vector<4x8x8xbf16>
    %c0_27 = arith.constant 0 : index
    %c0_28 = arith.constant 0 : index
    %23 = vector.load %arg6[%c0_27, %c0_28] : memref<32x32xbf16, #tpu.memory_space<vmem>>, vector<32x32xbf16>
    %cst_29 = arith.constant dense<0.000000e+00> : vector<4x8x8xf32>
    %24 = tpu.matmul %20, %21, %cst_29 {dimension_numbers = #tpu.dot_dimension_numbers<[2], [2], [1], [1], [0, 0, 0, 1, 1, 1], [0], [0]>} : vector<4x8x8xbf16>, vector<4x8x8xbf16>, vector<4x8x8xf32> -> vector<4x8x8xf32>
    %cst_30 = arith.constant 0.353553385 : f32
    %25 = vector.broadcast %cst_30 : f32 to vector<4x8x8xf32>
    %26 = arith.mulf %24, %25 : vector<4x8x8xf32>
    %27 = vector.shape_cast %4 : vector<8x8xf32> to vector<1x8x8xf32>
    %28 = vector.broadcast %27 : vector<1x8x8xf32> to vector<4x8x8xf32>
    %29 = arith.addf %26, %28 : vector<4x8x8xf32>
    %cst_31 = arith.constant dense<0xFF800000> : vector<4x8xf32>
    %30 = vector.multi_reduction <maximumf>, %29, %cst_31 [2] : vector<4x8x8xf32> to vector<4x8xf32>
    %31 = vector.shape_cast %30 : vector<4x8xf32> to vector<4x8x1xf32>
    %32 = vector.broadcast %31 : vector<4x8x1xf32> to vector<4x8x8xf32>
    %33 = arith.subf %29, %32 : vector<4x8x8xf32>
    %34 = math.exp %33 : vector<4x8x8xf32>
    %cst_32 = arith.constant dense<0.000000e+00> : vector<4x8xf32>
    %35 = vector.multi_reduction <add>, %34, %cst_32 [2] : vector<4x8x8xf32> to vector<4x8xf32>
    %36 = vector.shape_cast %35 : vector<4x8xf32> to vector<4x8x1xf32>
    %37 = tpu.reciprocal %36 {approx = true} : vector<4x8x1xf32> -> vector<4x8x1xf32>
    %38 = vector.broadcast %37 : vector<4x8x1xf32> to vector<4x8x8xf32>
    %39 = arith.mulf %34, %38 : vector<4x8x8xf32>
    %40 = arith.truncf %39 : vector<4x8x8xf32> to vector<4x8x8xbf16>
    %cst_33 = arith.constant dense<0.000000e+00> : vector<4x8x8xf32>
    %41 = tpu.matmul %40, %22, %cst_33 {dimension_numbers = #tpu.dot_dimension_numbers<[2], [1], [1], [2], [0, 0, 0, 1, 1, 2], [0], [0]>} : vector<4x8x8xbf16>, vector<4x8x8xbf16>, vector<4x8x8xf32> -> vector<4x8x8xf32>
    %42 = tpu.transpose %41, [1, 0, 2] : vector<4x8x8xf32> -> vector<8x4x8xf32>
    %43 = vector.shape_cast %42 : vector<8x4x8xf32> to vector<8x32xf32>
    %44 = arith.truncf %43 : vector<8x32xf32> to vector<8x32xbf16>
    %cst_34 = arith.constant dense<0.000000e+00> : vector<8x32xf32>
    %45 = tpu.matmul %44, %23, %cst_34 {dimension_numbers = #tpu.dot_dimension_numbers<[1], [0], [0], [1], [0, 0, 1, 1], [], []>} : vector<8x32xbf16>, vector<32x32xbf16>, vector<8x32xf32> -> vector<8x32xf32>
    %46 = arith.addf %1, %45 : vector<8x32xf32>
    %cst_35 = arith.constant dense<0.000000e+00> : vector<8xf32>
    %47 = vector.multi_reduction <add>, %46, %cst_35 [1] : vector<8x32xf32> to vector<8xf32>
    %48 = vector.shape_cast %47 : vector<8xf32> to vector<8x1xf32>
    %cst_36 = arith.constant 3.200000e+01 : f32
    %49 = vector.broadcast %cst_36 : f32 to vector<8x1xf32>
    %50 = arith.divf %48, %49 : vector<8x1xf32>
    %51 = vector.broadcast %50 : vector<8x1xf32> to vector<8x32xf32>
    %52 = arith.subf %46, %51 : vector<8x32xf32>
    %53 = arith.mulf %52, %52 : vector<8x32xf32>
    %cst_37 = arith.constant dense<0.000000e+00> : vector<8xf32>
    %54 = vector.multi_reduction <add>, %53, %cst_37 [1] : vector<8x32xf32> to vector<8xf32>
    %55 = vector.shape_cast %54 : vector<8xf32> to vector<8x1xf32>
    %cst_38 = arith.constant 3.200000e+01 : f32
    %56 = vector.broadcast %cst_38 : f32 to vector<8x1xf32>
    %57 = arith.divf %55, %56 : vector<8x1xf32>
    %58 = vector.broadcast %50 : vector<8x1xf32> to vector<8x32xf32>
    %59 = arith.subf %46, %58 : vector<8x32xf32>
    %cst_39 = arith.constant 9.99999974E-6 : f32
    %60 = vector.broadcast %cst_39 : f32 to vector<8x1xf32>
    %61 = arith.addf %57, %60 : vector<8x1xf32>
    %62 = math.rsqrt %61 : vector<8x1xf32>
    %63 = vector.broadcast %62 : vector<8x1xf32> to vector<8x32xf32>
    %64 = arith.mulf %59, %63 : vector<8x32xf32>
    %65 = vector.broadcast %6 : vector<1x32xf32> to vector<8x32xf32>
    %66 = arith.mulf %64, %65 : vector<8x32xf32>
    %67 = vector.broadcast %7 : vector<1x32xf32> to vector<8x32xf32>
    %68 = arith.addf %66, %67 : vector<8x32xf32>
    %69 = arith.truncf %68 : vector<8x32xf32> to vector<8x32xbf16>
    %c0_40 = arith.constant 0 : index
    %c0_41 = arith.constant 0 : index
    %70 = vector.load %arg7[%c0_40, %c0_41] : memref<32x32xbf16, #tpu.memory_space<vmem>>, vector<32x32xbf16>
    %cst_42 = arith.constant dense<0.000000e+00> : vector<8x32xf32>
    %71 = tpu.matmul %69, %70, %cst_42 {dimension_numbers = #tpu.dot_dimension_numbers<[1], [0], [0], [1], [0, 0, 1, 1], [], []>} : vector<8x32xbf16>, vector<32x32xbf16>, vector<8x32xf32> -> vector<8x32xf32>
    %72 = arith.truncf %3 : vector<8x32xf32> to vector<8x32xbf16>
    %c0_43 = arith.constant 0 : index
    %c0_44 = arith.constant 0 : index
    %73 = vector.load %arg8[%c0_43, %c0_44] : memref<32x64xbf16, #tpu.memory_space<vmem>>, vector<32x64xbf16>
    %cst_45 = arith.constant dense<0.000000e+00> : vector<8x64xf32>
    %74 = tpu.matmul %72, %73, %cst_45 {dimension_numbers = #tpu.dot_dimension_numbers<[1], [0], [0], [1], [0, 0, 1, 1], [], []>} : vector<8x32xbf16>, vector<32x64xbf16>, vector<8x64xf32> -> vector<8x64xf32>
    %75 = vector.shape_cast %71 : vector<8x32xf32> to vector<8x4x8xf32>
    %76 = tpu.transpose %75, [1, 0, 2] : vector<8x4x8xf32> -> vector<4x8x8xf32>
    %77 = arith.truncf %76 : vector<4x8x8xf32> to vector<4x8x8xbf16>
    %78 = vector.shape_cast %74 : vector<8x64xf32> to vector<8x8x8xf32>
    %79 = tpu.transpose %78, [1, 0, 2] : vector<8x8x8xf32> -> vector<8x8x8xf32>
    %80 = arith.truncf %79 : vector<8x8x8xf32> to vector<8x8x8xbf16>
    %81 = vector.extract_strided_slice %80 {offsets = [0, 0, 0], sizes = [4, 8, 8], strides = [1, 1, 1]} : vector<8x8x8xbf16> to vector<4x8x8xbf16>
    %82 = vector.extract_strided_slice %80 {offsets = [4, 0, 0], sizes = [4, 8, 8], strides = [1, 1, 1]} : vector<8x8x8xbf16> to vector<4x8x8xbf16>
    %c0_46 = arith.constant 0 : index
    %c0_47 = arith.constant 0 : index
    %83 = vector.load %arg9[%c0_46, %c0_47] : memref<32x32xbf16, #tpu.memory_space<vmem>>, vector<32x32xbf16>
    %cst_48 = arith.constant dense<0.000000e+00> : vector<4x8x8xf32>
    %84 = tpu.matmul %77, %81, %cst_48 {dimension_numbers = #tpu.dot_dimension_numbers<[2], [2], [1], [1], [0, 0, 0, 1, 1, 1], [0], [0]>} : vector<4x8x8xbf16>, vector<4x8x8xbf16>, vector<4x8x8xf32> -> vector<4x8x8xf32>
    %cst_49 = arith.constant 0.353553385 : f32
    %85 = vector.broadcast %cst_49 : f32 to vector<4x8x8xf32>
    %86 = arith.mulf %84, %85 : vector<4x8x8xf32>
    %87 = vector.shape_cast %5 : vector<8x8xf32> to vector<1x8x8xf32>
    %88 = vector.broadcast %87 : vector<1x8x8xf32> to vector<4x8x8xf32>
    %89 = arith.addf %86, %88 : vector<4x8x8xf32>
    %cst_50 = arith.constant dense<0xFF800000> : vector<4x8xf32>
    %90 = vector.multi_reduction <maximumf>, %89, %cst_50 [2] : vector<4x8x8xf32> to vector<4x8xf32>
    %91 = vector.shape_cast %90 : vector<4x8xf32> to vector<4x8x1xf32>
    %92 = vector.broadcast %91 : vector<4x8x1xf32> to vector<4x8x8xf32>
    %93 = arith.subf %89, %92 : vector<4x8x8xf32>
    %94 = math.exp %93 : vector<4x8x8xf32>
    %cst_51 = arith.constant dense<0.000000e+00> : vector<4x8xf32>
    %95 = vector.multi_reduction <add>, %94, %cst_51 [2] : vector<4x8x8xf32> to vector<4x8xf32>
    %96 = vector.shape_cast %95 : vector<4x8xf32> to vector<4x8x1xf32>
    %97 = tpu.reciprocal %96 {approx = true} : vector<4x8x1xf32> -> vector<4x8x1xf32>
    %98 = vector.broadcast %97 : vector<4x8x1xf32> to vector<4x8x8xf32>
    %99 = arith.mulf %94, %98 : vector<4x8x8xf32>
    %100 = arith.truncf %99 : vector<4x8x8xf32> to vector<4x8x8xbf16>
    %cst_52 = arith.constant dense<0.000000e+00> : vector<4x8x8xf32>
    %101 = tpu.matmul %100, %82, %cst_52 {dimension_numbers = #tpu.dot_dimension_numbers<[2], [1], [1], [2], [0, 0, 0, 1, 1, 2], [0], [0]>} : vector<4x8x8xbf16>, vector<4x8x8xbf16>, vector<4x8x8xf32> -> vector<4x8x8xf32>
    %102 = tpu.transpose %101, [1, 0, 2] : vector<4x8x8xf32> -> vector<8x4x8xf32>
    %103 = vector.shape_cast %102 : vector<8x4x8xf32> to vector<8x32xf32>
    %104 = arith.truncf %103 : vector<8x32xf32> to vector<8x32xbf16>
    %cst_53 = arith.constant dense<0.000000e+00> : vector<8x32xf32>
    %105 = tpu.matmul %104, %83, %cst_53 {dimension_numbers = #tpu.dot_dimension_numbers<[1], [0], [0], [1], [0, 0, 1, 1], [], []>} : vector<8x32xbf16>, vector<32x32xbf16>, vector<8x32xf32> -> vector<8x32xf32>
    %106 = arith.addf %68, %105 : vector<8x32xf32>
    %cst_54 = arith.constant dense<0.000000e+00> : vector<8xf32>
    %107 = vector.multi_reduction <add>, %106, %cst_54 [1] : vector<8x32xf32> to vector<8xf32>
    %108 = vector.shape_cast %107 : vector<8xf32> to vector<8x1xf32>
    %cst_55 = arith.constant 3.200000e+01 : f32
    %109 = vector.broadcast %cst_55 : f32 to vector<8x1xf32>
    %110 = arith.divf %108, %109 : vector<8x1xf32>
    %111 = vector.broadcast %110 : vector<8x1xf32> to vector<8x32xf32>
    %112 = arith.subf %106, %111 : vector<8x32xf32>
    %113 = arith.mulf %112, %112 : vector<8x32xf32>
    %cst_56 = arith.constant dense<0.000000e+00> : vector<8xf32>
    %114 = vector.multi_reduction <add>, %113, %cst_56 [1] : vector<8x32xf32> to vector<8xf32>
    %115 = vector.shape_cast %114 : vector<8xf32> to vector<8x1xf32>
    %cst_57 = arith.constant 3.200000e+01 : f32
    %116 = vector.broadcast %cst_57 : f32 to vector<8x1xf32>
    %117 = arith.divf %115, %116 : vector<8x1xf32>
    %118 = vector.broadcast %110 : vector<8x1xf32> to vector<8x32xf32>
    %119 = arith.subf %106, %118 : vector<8x32xf32>
    %cst_58 = arith.constant 9.99999974E-6 : f32
    %120 = vector.broadcast %cst_58 : f32 to vector<8x1xf32>
    %121 = arith.addf %117, %120 : vector<8x1xf32>
    %122 = math.rsqrt %121 : vector<8x1xf32>
    %123 = vector.broadcast %122 : vector<8x1xf32> to vector<8x32xf32>
    %124 = arith.mulf %119, %123 : vector<8x32xf32>
    %125 = vector.broadcast %8 : vector<1x32xf32> to vector<8x32xf32>
    %126 = arith.mulf %124, %125 : vector<8x32xf32>
    %127 = vector.broadcast %9 : vector<1x32xf32> to vector<8x32xf32>
    %128 = arith.addf %126, %127 : vector<8x32xf32>
    %129 = arith.truncf %128 : vector<8x32xf32> to vector<8x32xbf16>
    %c0_59 = arith.constant 0 : index
    %c0_60 = arith.constant 0 : index
    %130 = vector.load %arg10[%c0_59, %c0_60] : memref<32x64xbf16, #tpu.memory_space<vmem>>, vector<32x64xbf16>
    %cst_61 = arith.constant dense<0.000000e+00> : vector<8x64xf32>
    %131 = tpu.matmul %129, %130, %cst_61 {dimension_numbers = #tpu.dot_dimension_numbers<[1], [0], [0], [1], [0, 0, 1, 1], [], []>} : vector<8x32xbf16>, vector<32x64xbf16>, vector<8x64xf32> -> vector<8x64xf32>
    %132 = vector.broadcast %12 : vector<1x64xf32> to vector<8x64xf32>
    %133 = arith.addf %131, %132 : vector<8x64xf32>
    %cst_62 = arith.constant 0.000000e+00 : f32
    %134 = vector.broadcast %cst_62 : f32 to vector<8x64xf32>
    %135 = arith.maximumf %133, %134 : vector<8x64xf32>
    %136 = arith.truncf %135 : vector<8x64xf32> to vector<8x64xbf16>
    %c0_63 = arith.constant 0 : index
    %c0_64 = arith.constant 0 : index
    %137 = vector.load %arg12[%c0_63, %c0_64] : memref<64x32xbf16, #tpu.memory_space<vmem>>, vector<64x32xbf16>
    %cst_65 = arith.constant dense<0.000000e+00> : vector<8x32xf32>
    %138 = tpu.matmul %136, %137, %cst_65 {dimension_numbers = #tpu.dot_dimension_numbers<[1], [0], [0], [1], [0, 0, 1, 1], [], []>} : vector<8x64xbf16>, vector<64x32xbf16>, vector<8x32xf32> -> vector<8x32xf32>
    %139 = vector.broadcast %13 : vector<1x32xf32> to vector<8x32xf32>
    %140 = arith.addf %138, %139 : vector<8x32xf32>
    %141 = arith.addf %128, %140 : vector<8x32xf32>
    %cst_66 = arith.constant dense<0.000000e+00> : vector<8xf32>
    %142 = vector.multi_reduction <add>, %141, %cst_66 [1] : vector<8x32xf32> to vector<8xf32>
    %143 = vector.shape_cast %142 : vector<8xf32> to vector<8x1xf32>
    %cst_67 = arith.constant 3.200000e+01 : f32
    %144 = vector.broadcast %cst_67 : f32 to vector<8x1xf32>
    %145 = arith.divf %143, %144 : vector<8x1xf32>
    %146 = vector.broadcast %145 : vector<8x1xf32> to vector<8x32xf32>
    %147 = arith.subf %141, %146 : vector<8x32xf32>
    %148 = arith.mulf %147, %147 : vector<8x32xf32>
    %cst_68 = arith.constant dense<0.000000e+00> : vector<8xf32>
    %149 = vector.multi_reduction <add>, %148, %cst_68 [1] : vector<8x32xf32> to vector<8xf32>
    %150 = vector.shape_cast %149 : vector<8xf32> to vector<8x1xf32>
    %cst_69 = arith.constant 3.200000e+01 : f32
    %151 = vector.broadcast %cst_69 : f32 to vector<8x1xf32>
    %152 = arith.divf %150, %151 : vector<8x1xf32>
    %153 = vector.broadcast %145 : vector<8x1xf32> to vector<8x32xf32>
    %154 = arith.subf %141, %153 : vector<8x32xf32>
    %cst_70 = arith.constant 9.99999974E-6 : f32
    %155 = vector.broadcast %cst_70 : f32 to vector<8x1xf32>
    %156 = arith.addf %152, %155 : vector<8x1xf32>
    %157 = math.rsqrt %156 : vector<8x1xf32>
    %158 = vector.broadcast %157 : vector<8x1xf32> to vector<8x32xf32>
    %159 = arith.mulf %154, %158 : vector<8x32xf32>
    %160 = vector.broadcast %10 : vector<1x32xf32> to vector<8x32xf32>
    %161 = arith.mulf %159, %160 : vector<8x32xf32>
    %162 = vector.broadcast %11 : vector<1x32xf32> to vector<8x32xf32>
    %163 = arith.addf %161, %162 : vector<8x32xf32>
    %c0_71 = arith.constant 0 : index
    %c0_72 = arith.constant 0 : index
    %c0_73 = arith.constant 0 : index
    %164 = vector.load %arg20[%c0_71, %c0_72, %c0_73] : memref<1x8x32xf32, #tpu.memory_space<vmem>>, vector<1x8x32xf32>
    %165 = vector.shape_cast %164 : vector<1x8x32xf32> to vector<8x32xf32>
    %166 = vector.shape_cast %163 : vector<8x32xf32> to vector<1x8x32xf32>
    tpu.vector_store %arg20[%c0_71, %c0_72, %c0_73], %166 {strides = array<i32>} : memref<1x8x32xf32, #tpu.memory_space<vmem>>, vector<1x8x32xf32>,
    return
  }
  func.func @transform_0(%arg0: i32) -> (i32, i32, i32) {
    %c0_i32 = arith.constant 0 : i32
    %c0_i32_0 = arith.constant 0 : i32
    %c0_i32_1 = arith.constant 0 : i32
    return %arg0, %c0_i32, %c0_i32_0 : i32, i32, i32
  }
  func.func @transform_1(%arg0: i32) -> (i32, i32, i32) {
    %c0_i32 = arith.constant 0 : i32
    %c0_i32_0 = arith.constant 0 : i32
    %c0_i32_1 = arith.constant 0 : i32
    return %arg0, %c0_i32, %c0_i32_0 : i32, i32, i32
  }
  func.func @transform_2(%arg0: i32) -> (i32, i32) {
    %c0_i32 = arith.constant 0 : i32
    %c0_i32_0 = arith.constant 0 : i32
    %c0_i32_1 = arith.constant 0 : i32
    return %c0_i32, %c0_i32_0 : i32, i32
  }
  func.func @transform_3(%arg0: i32) -> (i32, i32) {
    %c0_i32 = arith.constant 0 : i32
    %c0_i32_0 = arith.constant 0 : i32
    %c0_i32_1 = arith.constant 0 : i32
    return %c0_i32, %c0_i32_0 : i32, i32
  }
  func.func @transform_4(%arg0: i32) -> (i32, i32) {
    %c0_i32 = arith.constant 0 : i32
    %c0_i32_0 = arith.constant 0 : i32
    %c0_i32_1 = arith.constant 0 : i32
    return %c0_i32, %c0_i32_0 : i32, i32
  }
  func.func @transform_5(%arg0: i32) -> (i32, i32) {
    %c0_i32 = arith.constant 0 : i32
    %c0_i32_0 = arith.constant 0 : i32
    %c0_i32_1 = arith.constant 0 : i32
    return %c0_i32, %c0_i32_0 : i32, i32
  }
  func.func @transform_6(%arg0: i32) -> (i32, i32) {
    %c0_i32 = arith.constant 0 : i32
    %c0_i32_0 = arith.constant 0 : i32
    %c0_i32_1 = arith.constant 0 : i32
    return %c0_i32, %c0_i32_0 : i32, i32
  }
  func.func @transform_7(%arg0: i32) -> (i32, i32) {
    %c0_i32 = arith.constant 0 : i32
    %c0_i32_0 = arith.constant 0 : i32
    %c0_i32_1 = arith.constant 0 : i32
    return %c0_i32, %c0_i32_0 : i32, i32
  }
  func.func @transform_8(%arg0: i32) -> (i32, i32) {
    %c0_i32 = arith.constant 0 : i32
    %c0_i32_0 = arith.constant 0 : i32
    %c0_i32_1 = arith.constant 0 : i32
    return %c0_i32, %c0_i32_0 : i32, i32
  }
  func.func @transform_9(%arg0: i32) -> (i32, i32) {
    %c0_i32 = arith.constant 0 : i32
    %c0_i32_0 = arith.constant 0 : i32
    %c0_i32_1 = arith.constant 0 : i32
    return %c0_i32, %c0_i32_0 : i32, i32
  }
  func.func @transform_10(%arg0: i32) -> (i32, i32) {
    %c0_i32 = arith.constant 0 : i32
    %c0_i32_0 = arith.constant 0 : i32
    %c0_i32_1 = arith.constant 0 : i32
    return %c0_i32, %c0_i32_0 : i32, i32
  }
  func.func @transform_11(%arg0: i32) -> (i32, i32) {
    %c0_i32 = arith.constant 0 : i32
    %c0_i32_0 = arith.constant 0 : i32
    %c0_i32_1 = arith.constant 0 : i32
    return %c0_i32, %c0_i32_0 : i32, i32
  }
  func.func @transform_12(%arg0: i32) -> (i32, i32) {
    %c0_i32 = arith.constant 0 : i32
    %c0_i32_0 = arith.constant 0 : i32
    %c0_i32_1 = arith.constant 0 : i32
    return %c0_i32, %c0_i32_0 : i32, i32
  }
  func.func @transform_13(%arg0: i32) -> (i32, i32) {
    %c0_i32 = arith.constant 0 : i32
    %c0_i32_0 = arith.constant 0 : i32
    %c0_i32_1 = arith.constant 0 : i32
    return %c0_i32, %c0_i32_0 : i32, i32
  }
  func.func @transform_14(%arg0: i32) -> (i32, i32) {
    %c0_i32 = arith.constant 0 : i32
    %c0_i32_0 = arith.constant 0 : i32
    %c0_i32_1 = arith.constant 0 : i32
    return %c0_i32, %c0_i32_0 : i32, i32
  }
  func.func @transform_15(%arg0: i32) -> (i32, i32) {
    %c0_i32 = arith.constant 0 : i32
    %c0_i32_0 = arith.constant 0 : i32
    %c0_i32_1 = arith.constant 0 : i32
    return %c0_i32, %c0_i32_0 : i32, i32
  }
  func.func @transform_16(%arg0: i32) -> (i32, i32) {
    %c0_i32 = arith.constant 0 : i32
    %c0_i32_0 = arith.constant 0 : i32
    %c0_i32_1 = arith.constant 0 : i32
    return %c0_i32, %c0_i32_0 : i32, i32
  }
  func.func @transform_17(%arg0: i32) -> (i32, i32) {
    %c0_i32 = arith.constant 0 : i32
    %c0_i32_0 = arith.constant 0 : i32
    %c0_i32_1 = arith.constant 0 : i32
    return %c0_i32, %c0_i32_0 : i32, i32
  }
  func.func @transform_18(%arg0: i32) -> (i32, i32) {
    %c0_i32 = arith.constant 0 : i32
    %c0_i32_0 = arith.constant 0 : i32
    %c0_i32_1 = arith.constant 0 : i32
    return %c0_i32, %c0_i32_0 : i32, i32
  }
  func.func @transform_19(%arg0: i32) -> (i32, i32, i32) {
    %c0_i32 = arith.constant 0 : i32
    %c0_i32_0 = arith.constant 0 : i32
    %c0_i32_1 = arith.constant 0 : i32
    return %arg0, %c0_i32, %c0_i32_0 : i32, i32, i32
  }
}

</mosaic_0001>

<bundles_post_ra>
// kernel: tpu_custom_call.1
= control target key start
LH: loop header
LB: loop body
LE: loop exit
PB: predicated region body
PF: predicated region fallthrough
CT: control target
= control target key end

     0   :  { %s5001_s0 = inlined_call_operand.vmem [shape: f32[2,8,32], index: 0, kind: input, shape index: {}]   ;;  %s5002_s1 = inlined_call_operand.vmem [shape: f32[2,8,32], index: 1, kind: input, shape index: {}]   ;;  %s5003_s2 = inlined_call_operand.hbm [shape: f32[8,8], index: 2, kind: input, shape index: {}]   ;;  %s5004_s3 = inlined_call_operand.hbm [shape: f32[8,8], index: 3, kind: input, shape index: {}]   ;;  %s5005_s4 = inlined_call_operand.vmem [shape: bf16[32,96], index: 4, kind: input, shape index: {}]   ;;  %s5006_s5 = inlined_call_operand.hbm [shape: bf16[32,32], index: 5, kind: input, shape index: {}]   ;;  %s5007_s6 = inlined_call_operand.hbm [shape: bf16[32,32], index: 6, kind: input, shape index: {}]   ;;  %s5008_s7 = inlined_call_operand.hbm [shape: bf16[32,64], index: 7, kind: input, shape index: {}]   ;;  %s5009_s8 = inlined_call_operand.hbm [shape: bf16[32,32], index: 8, kind: input, shape index: {}]   ;;  %s5010_s9 = inlined_call_operand.vmem [shape: bf16[32,64], index: 9, kind: input, shape index: {}]   ;;  %s5011_s10 = inlined_call_operand.vmem [shape: f32[1,64], index: 10, kind: input, shape index: {}]   ;;  %s5012_s11 = inlined_call_operand.vmem [shape: bf16[64,32], index: 11, kind: input, shape index: {}]   ;;  %s5013_s12 = inlined_call_operand.vmem [shape: f32[1,32], index: 12, kind: input, shape index: {}]   ;;  %s5014_s13 = inlined_call_operand.vmem [shape: f32[1,32], index: 13, kind: input, shape index: {}]   ;;  %s5015_s14 = inlined_call_operand.vmem [shape: f32[1,32], index: 14, kind: input, shape index: {}]   ;;  %s5016_s15 = inlined_call_operand.vmem [shape: f32[1,32], index: 15, kind: input, shape index: {}]   ;;  %s5017_s16 = inlined_call_operand.vmem [shape: f32[1,32], index: 16, kind: input, shape index: {}]   ;;  %s5018_s17 = inlined_call_operand.vmem [shape: f32[1,32], index: 17, kind: input, shape index: {}]   ;;  %s5019_s18 = inlined_call_operand.vmem [shape: f32[1,32], index: 18, kind: input, shape index: {}]   ;;  %s5020_s19 = inlined_call_operand.hbm [shape: f32[2,8,32], index: 19, kind: output, shape index: {}]  }
   0x1   :  { %5041 = sst [smem:[#allocation27_spill]] %s5001_s0 }
   0x2   :  { %5042 = sst [smem:[#allocation28_spill]] %s5002_s1 }
   0x3   :  { %5043 = sst [smem:[#allocation29_spill]] %s5003_s2 }
   0x4   :  { %5044 = sst [smem:[#allocation30_spill]] %s5004_s3 }
   0x5   :  { %5045 = sst [smem:[#allocation31_spill]] %s5006_s5 }
   0x6   :  { %5046 = sst [smem:[#allocation32_spill]] %s5018_s17 }
   0x7   :  { %5047 = sst [smem:[#allocation33_spill]] %s5019_s18 }
   0x8   :  { %5048 = sst [smem:[#allocation34_spill]] %s5020_s19 }
   0x9   :  { %24 = vsyncpa [#allocation3], 0 }
   0xa   :  { %25 = vsyncpa [#allocation6], 0 }
   0xb   :  { %26 = vsyncpa [#allocation9], 0 }
   0xc   :  { %27 = vsyncpa [#allocation12], 0 }
   0xd   :  { %28 = vsyncpa [#allocation4], 0 }
   0xe   :  { %30 = vsyncpa [#allocation4 + $0x1], 0  ;;  %s4308_s0 = smov 0   ;;  %s4310_s30 = smov 0  }
   0xf   :  { %s4312_s20 = smov 0   ;;  %s4314_s21 = smov 0  }
  0x10 LB: > { %5049 = sst [smem:[#allocation19_spill]] %s4167_s0  ;;  %s4329_s1 = sadd.s32 4294967295, %s4179_s21   ;;  %s4179_s21 = sphi %s4314_s21, %s5089_s21   ;;  %s4175_s20 = sphi %s4312_s20, %s5092_s20   ;;  %s4171_s30 = sphi %s4310_s30, %s5091_s30   ;;  %s4167_s0 = sphi %s4308_s0, %s5090_s0  }
  0x11   : > { %5050 = sst [smem:[#allocation20_spill]] %s4171_s30  ;;  %s3454_s22 = sadd.s32 4294967294, %s4179_s21  }
  0x12   : > { %5051 = sst [smem:[#allocation21_spill]] %s4175_s20  ;;  %s4333_s2 = sadd.s32 1, %s4179_s21  }
  0x13   : > { %5052 = sst [smem:[#allocation22_spill]] %s4179_s21  ;;  %s452_s23 = sadd.s32 1, %s4175_s20 }
  0x14   : > { %5053 = sst [smem:[#allocation23_spill]] %s4333_s2  ;;  %s449_s24 = ssub.s32 %s4179_s21, %s4333_s2 }
  0x15   : > { %p462_p0 = scmp.ne.s32.totalorder %s4175_s20, %s4171_s30  ;;  %p450_p1 = scmp.eq.s32.totalorder %s449_s24, 0 }
  0x16   : > { %p463_p2 = scmp.eq.s32.totalorder %s4329_s1, 1  ;;  %p468_p3 = scmp.ne.s32.totalorder %s4171_s30, %s4167_s0 }
  0x17   : > { %p469_p4 = scmp.eq.s32.totalorder %s3454_s22, 1  ;;  %p3455_p7 = scmp.ge.s32.totalorder %s4179_s21, 1 }
  0x18   : > { %s4344_s25 = scalar_select %p450_p1, %s4175_s20, %s452_s23  }
  0x19   : > { %p4346_p5 = por %p463_p2, %p462_p0  ;;  %p4350_p6 = por %p469_p4, %p468_p3 }
  0x1a   : > { %5054 = sst [smem:[#allocation24_spill]] %s4344_s25  ;;  %p476_p8 = scmp.lt.s32.totalorder %s4179_s21, 3 }
  0x1b   : > { %s5055_s3 = scalar_select %p4346_p5, 1, 0 }
  0x1c   : > { %s5057_s26 = scalar_select %p4350_p6, 1, 0 }
  0x1d   : > { %5056 = sst [smem:[#allocation25_spill]] %s5055_s3  ;;  %p5030_p9 = scmp.eq.s32.totalorder %s4329_s1, 0 }
  0x1e   : > { %5058 = sst [smem:[#allocation26_spill]] %s5057_s26  ;;  %p4357_p10 = pnand %p3455_p7, %p476_p8 }
  0x1f   : > { %s4181_s28 = smov [#allocation5]   ;;  %s4182_s23 = smov [#allocation8]  }
  0x20   : > { %s5059_s27 = scalar_select %p4357_p10, 1, 0 }
  0x21   : > { %s500_s29 = sshll.u32 %s4181_s28, 4  ;;  %p3785_p11 = pneg %p4357_p10  ;;  %s501_s29 = int_to_ptr.vmem [resolvable:$true] %s500_s29 }
  0x22   : > { %s526_s24 = sshll.u32 %s4182_s23, 4  ;;  %s4183_s25 = smov [#allocation2]   ;;  %s4369_s24 = int_to_ptr.vmem [resolvable:$true] %s526_s24 }
  0x23   : > { %p4365_p12 = pnand %p5030_p9, %p3785_p11  ;;  %s4371_s20 = sshll.u32 %s4183_s25, 4  ;;  %s490_s20 = int_to_ptr.vmem [resolvable:$true] %s4371_s20 }
  0x24   : > { %s5061_s0 = sld [smem:[#allocation30_spill]] }
  0x25   : > { %p4381_p0 = pneg %p4365_p12 }
  0x2a   : > { %s5062_s19 = smov %s5061_s0  ;;  %s3933_s28 = scalar_lea.hbm %s5061_s0, 128 }
  0x2b   : > { %p3934_p13 = scmp.ne.s32.totalorder %s5062_s19, %s3933_s28  ;;  %p3940_p3 = scmp.lt.u32.totalorder %s3933_s28, %s5062_s19 }
  0x2d   : > { %p3936_p1 = pnand %p4381_p0, %p3934_p13 }
  0x2f   : > { %p3937_p2 = pneg %p3936_p1 }
  0x31   : > { %p3942_p4 = pnand %p3940_p3, %p3937_p2 }
  0x33   : > { %3945 = shalt.err (!%p3942_p4)
}
  0x34   : > { %s3946_s0 = scalar_lea.vmem %s501_s29, 128  ;;  %p3954_p9 = scmp.lt.s32.totalorder %s501_s29, %s501_s29 }
  0x35   : > { %p3947_p7 = scmp.ne.s32.totalorder %s501_s29, %s3946_s0  ;;  %p3955_p6 = scmp.lt.s32.totalorder %s3946_s0, %s3946_s0 }
  0x37   : > { %p3949_p8 = pnand %p3947_p7, %p4381_p0  ;;  %p3956_p5 = por %p3955_p6, %p3954_p9 }
  0x39   : > { %p3950_p11 = pneg %p3949_p8 }
  0x3b   : > { %p3957_p10 = pnand %p3956_p5, %p3950_p11 }
  0x3d   : > { %3960 = shalt.err (!%p3957_p10)
}
  0x3e   : > { %3791 = dma.hbm_to_vmem [thread:$0]  (!%p4365_p12), %s5062_s19, 128, %s501_s29, [#allocation6]  }
  0x3f   : > { %s3961_s28 = scalar_lea.hbm %s5007_s6, 256 }
  0x40   : > { %p3962_p13 = scmp.ne.s32.totalorder %s5007_s6, %s3961_s28  ;;  %p3968_p5 = scmp.lt.u32.totalorder %s3961_s28, %s5007_s6 }
  0x42   : > { %p3964_p1 = pnand %p3962_p13, %p4381_p0 }
  0x44   : > { %p3965_p6 = pneg %p3964_p1 }
  0x46   : > { %p3970_p9 = pnand %p3968_p5, %p3965_p6 }
  0x48   : > { %3973 = shalt.err (!%p3970_p9)
}
  0x49   : > { %s3974_s29 = scalar_lea.vmem %s4369_s24, 256  ;;  %p3982_p4 = scmp.lt.s32.totalorder %s4369_s24, %s4369_s24 }
  0x4a   : > { %p3975_p10 = scmp.ne.s32.totalorder %s4369_s24, %s3974_s29  ;;  %p3983_p7 = scmp.lt.s32.totalorder %s3974_s29, %s3974_s29 }
  0x4c   : > { %p3977_p2 = pnand %p3975_p10, %p4381_p0  ;;  %p3984_p8 = por %p3983_p7, %p3982_p4 }
  0x4e   : > { %p3978_p3 = pneg %p3977_p2 }
  0x50   : > { %p3985_p11 = pnand %p3984_p8, %p3978_p3 }
  0x52   : > { %3988 = shalt.err (!%p3985_p11)
}
  0x53   : > { %s5037_s18 = smov 64   ;;  %s5039_s3 = smov 4  }
  0x54   : > { %3797 = dma.hbm_to_vmem [thread:$0]  (!%p4365_p12), %s5007_s6, 256, %s4369_s24, [#allocation9], %s5037_s18, %s5037_s18, %s5039_s3  }
  0x55   : > { %s5064_s23 = sld [smem:[#allocation29_spill]] }
  0x5b   : > { %s3989_s25 = scalar_lea.hbm %s5064_s23, 128 }
  0x5c   : > { %p3990_p13 = scmp.ne.s32.totalorder %s5064_s23, %s3989_s25  ;;  %p3996_p5 = scmp.lt.u32.totalorder %s3989_s25, %s5064_s23 }
  0x5e   : > { %p3992_p1 = pnand %p3990_p13, %p4381_p0 }
  0x60   : > { %p3993_p6 = pneg %p3992_p1 }
  0x62   : > { %p3998_p9 = pnand %p3996_p5, %p3993_p6 }
  0x64   : > { %4001 = shalt.err (!%p3998_p9)
}
  0x65   : > { %s4002_s21 = scalar_lea.vmem %s490_s20, 128  ;;  %p4010_p4 = scmp.lt.s32.totalorder %s490_s20, %s490_s20 }
  0x66   : > { %p4003_p10 = scmp.ne.s32.totalorder %s490_s20, %s4002_s21  ;;  %p4011_p7 = scmp.lt.s32.totalorder %s4002_s21, %s4002_s21 }
  0x68   : > { %p4005_p2 = pnand %p4003_p10, %p4381_p0  ;;  %p4012_p8 = por %p4011_p7, %p4010_p4 }
  0x6a   : > { %p4006_p3 = pneg %p4005_p2 }
  0x6c   : > { %p4013_p11 = pnand %p4012_p8, %p4006_p3 }
  0x6e   : > { %4016 = shalt.err (!%p4013_p11)
}
  0x6f   : > { %3788 = dma.hbm_to_vmem [thread:$0]  (!%p4365_p12), %s5064_s23, 128, %s490_s20, [#allocation3]  }
  0x70   : > { %s4186_s19 = smov [#allocation7]   ;;  %s4187_s26 = smov [#allocation10]  }
  0x71   : > { %s513_s30 = sshll.u32 %s4186_s19, 4  ;;  %s539_s28 = sshll.u32 %s4187_s26, 4  ;;  %s514_s30 = int_to_ptr.vmem [resolvable:$true] %s513_s30  ;;  %s540_s28 = int_to_ptr.vmem [resolvable:$true] %s539_s28 }
  0x72   : > { %s5065_s5 = sld [smem:[#allocation31_spill]] }
  0x78   : > { %s4017_s29 = scalar_lea.hbm %s5065_s5, 256 }
  0x79   : > { %p4018_p13 = scmp.ne.s32.totalorder %s5065_s5, %s4017_s29  ;;  %p4024_p5 = scmp.lt.u32.totalorder %s4017_s29, %s5065_s5 }
  0x7b   : > { %p4020_p1 = pnand %p4018_p13, %p4381_p0 }
  0x7d   : > { %p4021_p6 = pneg %p4020_p1 }
  0x7f   : > { %p4026_p9 = pnand %p4024_p5, %p4021_p6 }
  0x81   : > { %4029 = shalt.err (!%p4026_p9)
}
  0x82   : > { %s4030_s20 = scalar_lea.vmem %s514_s30, 256  ;;  %p4038_p4 = scmp.lt.s32.totalorder %s514_s30, %s514_s30 }
  0x83   : > { %p4031_p10 = scmp.ne.s32.totalorder %s514_s30, %s4030_s20  ;;  %p4039_p7 = scmp.lt.s32.totalorder %s4030_s20, %s4030_s20 }
  0x85   : > { %p4033_p2 = pnand %p4031_p10, %p4381_p0  ;;  %p4040_p8 = por %p4039_p7, %p4038_p4 }
  0x87   : > { %p4034_p3 = pneg %p4033_p2 }
  0x89   : > { %p4041_p11 = pnand %p4040_p8, %p4034_p3 }
  0x8b   : > { %4044 = shalt.err (!%p4041_p11)
}
  0x8c   : > { %s5066_s18 = smov 4   ;;  %s5067_s2 = smov 64  }
  0x8d   : > { %3794 = dma.hbm_to_vmem [thread:$0]  (!%p4365_p12), %s5065_s5, 256, %s514_s30, [#allocation6], %s5067_s2, %s5067_s2, %s5066_s18  }
  0x8e   : > { %s4045_s0 = scalar_lea.hbm %s5008_s7, 256 }
  0x8f   : > { %p4046_p13 = scmp.ne.s32.totalorder %s5008_s7, %s4045_s0  ;;  %p4052_p5 = scmp.lt.u32.totalorder %s4045_s0, %s5008_s7 }
  0x91   : > { %p4048_p1 = pnand %p4046_p13, %p4381_p0 }
  0x93   : > { %p4049_p6 = pneg %p4048_p1 }
  0x95   : > { %p4054_p9 = pnand %p4052_p5, %p4049_p6 }
  0x97   : > { %4057 = shalt.err (!%p4054_p9)
}
  0x98   : > { %s4058_s3 = scalar_lea.vmem %s540_s28, 256  ;;  %p4066_p4 = scmp.lt.s32.totalorder %s540_s28, %s540_s28 }
  0x99   : > { %p4059_p10 = scmp.ne.s32.totalorder %s540_s28, %s4058_s3  ;;  %p4067_p7 = scmp.lt.s32.totalorder %s4058_s3, %s4058_s3 }
  0x9b   : > { %p4061_p2 = pnand %p4059_p10, %p4381_p0  ;;  %p4068_p8 = por %p4067_p7, %p4066_p4 }
  0x9d   : > { %p4062_p3 = pneg %p4061_p2 }
  0x9f   : > { %p4069_p11 = pnand %p4068_p8, %p4062_p3 }
  0xa1   : > { %4072 = shalt.err (!%p4069_p11)
}
  0xa2   : > { %3800 = dma.hbm_to_vmem [thread:$0]  (!%p4365_p12), %s5008_s7, 256, %s540_s28, [#allocation9], %s5067_s2, %s5067_s2, %s5066_s18  }
  0xa3   : > { %s4188_s26 = smov [#allocation11]   ;;  %s4073_s21 = scalar_lea.hbm %s5009_s8, 256 }
  0xa4   : > { %s552_s25 = sshll.u32 %s4188_s26, 4  ;;  %p4074_p13 = scmp.ne.s32.totalorder %s5009_s8, %s4073_s21  ;;  %s553_s25 = int_to_ptr.vmem [resolvable:$true] %s552_s25 }
  0xa5   : > { %p4080_p5 = scmp.lt.u32.totalorder %s4073_s21, %s5009_s8 }
  0xa6   : > { %p4076_p1 = pnand %p4074_p13, %p4381_p0 }
  0xa8   : > { %p4077_p6 = pneg %p4076_p1 }
  0xaa   : > { %p4082_p9 = pnand %p4080_p5, %p4077_p6 }
  0xac   : > { %4085 = shalt.err (!%p4082_p9)
}
  0xad   : > { %s4086_s28 = scalar_lea.vmem %s553_s25, 256  ;;  %p4094_p4 = scmp.lt.s32.totalorder %s553_s25, %s553_s25 }
  0xae   : > { %p4087_p10 = scmp.ne.s32.totalorder %s553_s25, %s4086_s28  ;;  %p4095_p7 = scmp.lt.s32.totalorder %s4086_s28, %s4086_s28 }
  0xb0   : > { %p4089_p2 = pnand %p4087_p10, %p4381_p0  ;;  %p4096_p8 = por %p4095_p7, %p4094_p4 }
  0xb2   : > { %p4090_p3 = pneg %p4089_p2 }
  0xb4   : > { %p4097_p11 = pnand %p4096_p8, %p4090_p3 }
  0xb6   : > { %4100 = shalt.err (!%p4097_p11)
}
  0xb7   : > { %3803 = dma.hbm_to_vmem [thread:$0]  (!%p4365_p12), %s5009_s8, 256, %s553_s25, [#allocation12], %s5067_s2, %s5067_s2, %s5066_s18  }
  0xb8   : > { %p5068_p13 = scmp.ne.s32.totalorder %s5059_s27, 0 }
  0xb9   : > { %p5069_p0 = scmp.eq.s32.totalorder (!%p5068_p13), %s4329_s1, 0 }
  0xba   : > { %612 = sbr.rel (%p5068_p13) target bundleno = 4622 (0x120e), region = 96 }
  0xc1   : > { %4146 = dma.done.wait (%p5069_p0), [#allocation3], 128   ;;  %p5070_p1 = pmov %p5069_p0 }
  0xc2   : > { %p5071_p6 = pmov %p5069_p0 }
  0xc3   : > { %4148 = vsyncadd (%p5070_p1), [#allocation3], 4294967168 }
  0xc4   : > { %4150 = dma.done.wait (%p5071_p6), [#allocation6], 384   ;;  %p5072_p5 = pmov %p5069_p0 }
  0xc5   : > { %p5073_p9 = pmov %p5069_p0 }
  0xc6   : > { %4152 = vsyncadd (%p5072_p5), [#allocation6], 4294966912 }
  0xc7   : > { %4154 = dma.done.wait (%p5073_p9), [#allocation9], 512   ;;  %p5074_p12 = pmov %p5069_p0 }
  0xc8   : > { %p5075_p10 = pmov %p5069_p0 }
  0xc9   : > { %4156 = vsyncadd (%p5074_p12), [#allocation9], 4294966784 }
  0xca   : > { %4158 = dma.done.wait (%p5075_p10), [#allocation12], 256   ;;  %p5076_p2 = pmov %p5069_p0 }
  0xcb   : > { %p691_p3 = scmp.lt.s32.totalorder %s4329_s1, 1  ;;  %v4189_v0 = vmov 0.0   ;;  %vm4190_vm0 = vmmov 0   ;;  %s5077_s2 = sld [smem:[#allocation27_spill]]  ;;  %v3879_v1 = vld [vmem:[%s5005_s4] sm:$0xff]   ;;  %v3880_v2 = vld [vmem:[%s5005_s4 + $0x8] sm:$0xff]   ;;  %v812_v11 = vlaneseq }
  0xcc   : > { %4160 = vsyncadd (%p5076_p2), [#allocation12], 4294967040  ;;  %3603 = vmatprep.subr.bf16.mxu1 %v4189_v0  ;;  %3607 = vmatprep.mubr.msk.bf16.mxu1 %vm4190_vm0, %v4189_v0  ;;  %vm729_vm1 = vcmask 261120   ;;  %s4191_s21 = smov 80   ;;  %s4192_s24 = smov 96   ;;  %vm1231_vm2 = vcmask 64512  }
  0xcd   : > { %s4528_s17 = scalar_select %p691_p3, %s4329_s1, 1  ;;  %3617 = vmatprep.subr.bf16.mxu0 %v4189_v0  ;;  %3619 = vmatprep.mubr.msk.bf16.mxu0 %vm4190_vm0, %v4189_v0  ;;  %v4198_v9 = vmov 1983009808   ;;  %v4199_v12 = vmov 1934713408   ;;  %v813_v15 = vshrl.u32 %v812_v11, 7 }
  0xce   : > { %3604 = vmatpush3.bf16.msra.mxu1 %v3879_v1  ;;  %s4193_s20 = smov 72   ;;  %s4194_s3 = smov 88   ;;  %v810_v10 = vunpack.c.l.s4 %v4198_v9  ;;  %v874_v13 = vunpack.c.l.s4 %v4199_v12  ;;  %vm1475_vm3 = vcmask 1043456   ;;  %vm1806_vm4 = vcmask 130048  }
  0xcf   : > { %s3471_s27 = sshll.u32 %s4528_s17, 3  ;;  %3605 = vmatprep.subr.bf16.mxu1 %v4189_v0  ;;  %s4195_s28 = smov 112   ;;  %vm1808_vm5 = vcmask 195584   ;;  %vm3236_vm6 = vcmask 523264  }
  0xd0   : > { %s4196_s5 = smov 120   ;;  %s4197_s30 = smov 104   ;;  %v811_v14 = vunpack.c.0.s8 %v810_v10  ;;  %v875_v18 = vunpack.c.0.s8 %v874_v13 }
  0xd1   : > { %s694_s19 = scalar_lea.vmem %s5077_s2, %s3471_s27  ;;  %s4200_s22 = smov 56  }
  0xd2   : > { %v4545_v3 = vld [vmem:[%s694_s19] sm:$0xff]  ;;  %3606 = vmatpush3.bf16.msra.mxu1 %v3880_v2  ;;  %v4570_v19 = vsub.s32 %v811_v14, %v813_v15  ;;  %v4572_v26 = vsub.s32 %v875_v18, %v813_v15  ;;  %s4201_s18 = smov 64   ;;  %s4202_s2 = smov 48  }
  0xd3   : > { %v712_v4 = vpack.c.bf16 %v4545_v3, %v4545_v3  ;;  %3611 = vmatprep.subr.bf16.mxu1 %v4189_v0  ;;  %s4203_s19 = smov 40   ;;  %s4204_s26 = smov 16  }
  0xd4   : > { %s4205_s25 = smov 8   ;;  %s4206_s0 = smov 24  }
  0xd5   : > { %3608 = vmatmul.mubr.msk.bf16.vlgmr.msra.gmra.mrb[0].mxu1 %vm729_vm1, %v712_v4  ;;  %s3545_s17 = sshll.u32 %s4329_s1, 7  ;;  %s4207_s1 = smov [#allocation13]  }
  0xd6   : > { %3613 = vmatprep.mubr.msk.bf16.mxu1 %vm4190_vm0, %v4189_v0 }
 0x1a8   : > { %v4554_v5 = vpop.f32.mrb[0].mxu1 }
 0x1a9   : > { %789 = vrot.lane.b32.xlu1 %v4554_v5, %s4191_s21  ;;  %783 = vrot.lane.b32.xlu0 %v4554_v5, %s4192_s24  ;;  %v3609_v6 = vpop.f32.mrb[1].mxu1 }
 0x1aa   : > { %v770_v7 = vpop.f32.mrb[2].mxu1 }
 0x1ab   : > { %v3610_v8 = vpop.f32.mrb[3].mxu1 }
 0x1ad   : > { %792 = vrot.lane.b32.xlu1 %v4554_v5, %s4193_s20  ;;  %786 = vrot.lane.b32.xlu0 %v4554_v5, %s4194_s3 }
 0x1b1   : > { %777 = vrot.lane.b32.xlu1 %v4554_v5, %s4195_s28  ;;  %774 = vrot.lane.b32.xlu0 %v4554_v5, %s4196_s5 }
 0x1b5   : > { %780 = vrot.lane.b32.xlu0 %v4554_v5, %s4197_s30 }
 0x21b   : > { %v790_v16 = vpop.permute.xlu1 %789  ;;  %v784_v17 = vpop.permute.xlu0 %783 }
 0x21c   : > { %v839_v20 = vcombine.low %v784_v17, %v790_v16  ;;  %v840_v21 = vcombine.high %v784_v17, %v790_v16 }
 0x21e   : > { %v847_v27 = vrot.slane %v839_v20, %v4570_v19  ;;  %v854_v28 = vrot.slane %v840_v21, %v4570_v19 }
 0x21f   : > { %v793_v22 = vpop.permute.xlu1 %792  ;;  %v787_v23 = vpop.permute.xlu0 %786 }
 0x220   : > { %v855_v24 = vcombine.low %v787_v23, %v793_v22  ;;  %v856_v25 = vcombine.high %v787_v23, %v793_v22 }
 0x222   : > { %v863_v29 = vrot.slane %v855_v24, %v4570_v19  ;;  %v870_v30 = vrot.slane %v856_v25, %v4570_v19 }
 0x223   : > { %v775_v31 = vpop.permute.xlu0 %774  ;;  %v778_v36 = vpop.permute.xlu1 %777 }
 0x224   : > { %v903_v32 = vcombine.low %v847_v27, %v863_v29  ;;  %v904_v33 = vcombine.high %v847_v27, %v863_v29  ;;  %v919_v34 = vcombine.low %v854_v28, %v870_v30  ;;  %v920_v35 = vcombine.high %v854_v28, %v870_v30 }
 0x225   : > { %v807_v41 = vcombine.low %v4554_v5, %v778_v36  ;;  %v808_v42 = vcombine.high %v4554_v5, %v778_v36 }
 0x226   : > { %v911_v37 = vrot.slane %v903_v32, %v4572_v26  ;;  %v918_v38 = vrot.slane %v904_v33, %v4572_v26  ;;  %v927_v39 = vrot.slane %v919_v34, %v4572_v26  ;;  %v934_v40 = vrot.slane %v920_v35, %v4572_v26 }
 0x227   : > { %v781_v43 = vpop.permute.xlu0 %780  ;;  %v815_v54 = vrot.slane %v807_v41, %v4570_v19  ;;  %v822_v55 = vrot.slane %v808_v42, %v4570_v19 }
 0x228   : > { %v3477_v44 = vcombine.low %v911_v37, %v918_v38  ;;  %v3479_v45 = vcombine.high %v911_v37, %v918_v38  ;;  %v3481_v46 = vcombine.low %v927_v39, %v934_v40  ;;  %v3483_v47 = vcombine.high %v927_v39, %v934_v40 }
 0x229   : > { %v823_v48 = vcombine.low %v775_v31, %v781_v43  ;;  %v824_v49 = vcombine.high %v775_v31, %v781_v43 }
 0x22a   : > { %v1026_v50 = vrot.slane %v3477_v44, %v4570_v19  ;;  %v1042_v51 = vrot.slane %v3479_v45, %v4570_v19  ;;  %v1058_v52 = vrot.slane %v3481_v46, %v4570_v19  ;;  %v1074_v53 = vrot.slane %v3483_v47, %v4570_v19 }
 0x22b   : > { %v831_v56 = vrot.slane %v823_v48, %v4570_v19  ;;  %v838_v57 = vrot.slane %v824_v49, %v4570_v19 }
 0x22c   : > { %v1091_v58 = vcombine.low %v1026_v50, %v1042_v51  ;;  %v1123_v59 = vcombine.low %v1058_v52, %v1074_v53  ;;  %v1092_v60 = vcombine.high %v1026_v50, %v1042_v51  ;;  %v1124_v61 = vcombine.high %v1058_v52, %v1074_v53  ;;  %v702_v53 = vld [vmem:[#allocation2] sm:$0xff] }
 0x22d   : > { %v871_v62 = vcombine.low %v815_v54, %v831_v56  ;;  %v872_v63 = vcombine.high %v815_v54, %v831_v56  ;;  %v887_v1 = vcombine.low %v822_v55, %v838_v57  ;;  %v888_v2 = vcombine.high %v822_v55, %v838_v57 }
 0x22e   : > { %v1099_v4 = vrot.slane %v1091_v58, %v4572_v26  ;;  %v1131_v6 = vrot.slane %v1123_v59, %v4572_v26  ;;  %v1106_v13 = vrot.slane %v1092_v60, %v4572_v26  ;;  %v1138_v14 = vrot.slane %v1124_v61, %v4572_v26 }
 0x22f   : > { %v879_v7 = vrot.slane %v871_v62, %v4572_v26  ;;  %v886_v8 = vrot.slane %v872_v63, %v4572_v26  ;;  %v895_v9 = vrot.slane %v887_v1, %v4572_v26  ;;  %v902_v10 = vrot.slane %v888_v2, %v4572_v26 }
 0x230   : > { %v1143_v11 = vcombine.low %v1099_v4, %v1131_v6  ;;  %v1144_v12 = vcombine.high %v1099_v4, %v1131_v6  ;;  %v1145_v31 = vcombine.low %v1106_v13, %v1138_v14  ;;  %v1146_v32 = vcombine.high %v1106_v13, %v1138_v14 }
 0x231   : > { %v3476_v15 = vcombine.low %v879_v7, %v886_v8  ;;  %v3478_v16 = vcombine.high %v879_v7, %v886_v8  ;;  %v3480_v17 = vcombine.low %v895_v9, %v902_v10  ;;  %v3482_v18 = vcombine.high %v895_v9, %v902_v10 }
 0x232   : > { %v1219_v20 = vpack.c.bf16 %v1143_v11, %v1143_v11  ;;  %v1220_v21 = vpack.c.bf16 %v1144_v12, %v1144_v12  ;;  %v1221_v39 = vpack.c.bf16 %v1145_v31, %v1145_v31  ;;  %v1222_v40 = vpack.c.bf16 %v1146_v32, %v1146_v32 }
 0x233   : > { %v1019_v22 = vrot.slane %v3476_v15, %v4570_v19  ;;  %v1035_v23 = vrot.slane %v3478_v16, %v4570_v19  ;;  %v1051_v24 = vrot.slane %v3480_v17, %v4570_v19  ;;  %v1067_v25 = vrot.slane %v3482_v18, %v4570_v19 }
 0x234   : > { %v1236_v27 = vsel %vm1231_vm2, %v1219_v20, 0  ;;  %v1282_v28 = vsel %vm1231_vm2, %v1220_v21, 0  ;;  %v1328_v45 = vsel %vm1231_vm2, %v1221_v39, 0  ;;  %v1374_v46 = vsel %vm1231_vm2, %v1222_v40, 0 }
 0x235   : > { %v1075_v29 = vcombine.low %v1019_v22, %v1035_v23  ;;  %v1107_v30 = vcombine.low %v1051_v24, %v1067_v25  ;;  %3612 = vmatpush3.bf16.xpose.msra.mxu1 %v1236_v27  ;;  %3618 = vmatpush3.bf16.xpose.msra.mxu0 %v1282_v28  ;;  %v1076_v33 = vcombine.high %v1019_v22, %v1035_v23 }
 0x236   : > { %3623 = vmatprep.subr.bf16.mxu1 %v4189_v0  ;;  %v1108_v34 = vcombine.high %v1051_v24, %v1067_v25  ;;  %3629 = vmatprep.subr.bf16.mxu0 %v4189_v0 }
 0x237   : > { %v1083_v35 = vrot.slane %v1075_v29, %v4572_v26  ;;  %v1115_v36 = vrot.slane %v1107_v30, %v4572_v26  ;;  %v1090_v43 = vrot.slane %v1076_v33, %v4572_v26 }
 0x238   : > { %v1122_v44 = vrot.slane %v1108_v34, %v4572_v26 }
 0x239   : > { %v1139_v37 = vcombine.low %v1083_v35, %v1115_v36  ;;  %v1140_v38 = vcombine.high %v1083_v35, %v1115_v36 }
 0x23a   : > { %v1141_v47 = vcombine.low %v1090_v43, %v1122_v44  ;;  %v1142_v48 = vcombine.high %v1090_v43, %v1122_v44 }
 0x23b   : > { %v1215_v41 = vpack.c.bf16 %v1139_v37, %v1139_v37  ;;  %v1216_v42 = vpack.c.bf16 %v1140_v38, %v1140_v38 }
 0x23c   : > { %v1217_v49 = vpack.c.bf16 %v1141_v47, %v1141_v47  ;;  %v1218_v50 = vpack.c.bf16 %v1142_v48, %v1142_v48 }
 0x23d   : > { %3614 = vmatmul.mubr.msk.bf16.vlgmr.msra.gmra.mrb[4].mxu1 %vm1231_vm2, %v1215_v41  ;;  %3620 = vmatmul.mubr.msk.bf16.vlgmr.msra.gmra.mrb[0].mxu0 %vm1231_vm2, %v1216_v42 }
 0x23e   : > { %3624 = vmatpush3.bf16.xpose.msra.mxu1 %v1328_v45  ;;  %3630 = vmatpush3.bf16.xpose.msra.mxu0 %v1374_v46 }
 0x23f   : > { %3625 = vmatprep.mubr.msk.bf16.mxu1 %vm4190_vm0, %v4189_v0  ;;  %3631 = vmatprep.mubr.msk.bf16.mxu0 %vm4190_vm0, %v4189_v0 }
 0x240   : > { %3635 = vmatprep.subr.bf16.mxu1 %v4189_v0  ;;  %3641 = vmatprep.subr.bf16.mxu0 %v4189_v0 }
 0x245   : > { %3626 = vmatmul.mubr.msk.bf16.vlgmr.msra.gmra.mrb[8].mxu1 %vm1231_vm2, %v1217_v49  ;;  %3632 = vmatmul.mubr.msk.bf16.vlgmr.msra.gmra.mrb[4].mxu0 %vm1231_vm2, %v1218_v50 }
 0x246   : > { %3637 = vmatprep.mubr.msk.bf16.mxu1 %vm4190_vm0, %v4189_v0  ;;  %3643 = vmatprep.mubr.msk.bf16.mxu0 %vm4190_vm0, %v4189_v0 }
 0x310   : > { %v1272_v51 = vpop.f32.mrb[4].mxu1  ;;  %v1318_v52 = vpop.f32.mrb[0].mxu0 }
 0x311   : > { %v1416_v54 = vmul.f32 0.35355338, %v1272_v51  ;;  %v1417_v55 = vmul.f32 0.35355338, %v1318_v52  ;;  %v3615_v56 = vpop.f32.mrb[5].mxu1  ;;  %v3621_v57 = vpop.f32.mrb[1].mxu0 }
 0x312   : > { %v1275_v58 = vpop.f32.mrb[6].mxu1  ;;  %v1321_v59 = vpop.f32.mrb[2].mxu0 }
 0x313   : > { %v3616_v60 = vpop.f32.mrb[7].mxu1  ;;  %v3622_v61 = vpop.f32.mrb[3].mxu0  ;;  %v1421_v62 = vadd.f32 %v1417_v55, %v702_v53  ;;  %v1420_v63 = vadd.f32 %v1416_v54, %v702_v53 }
 0x315   : > { %v1427_v1 = vsel %vm1231_vm2, %v1421_v62, -inf  ;;  %v1424_v2 = vsel %vm1231_vm2, %v1420_v63, -inf }
 0x316   : > { %1428 = vmax.xlane.f32.xlu0 %v1427_v1  ;;  %1425 = vmax.xlane.f32.xlu1 %v1424_v2 }
 0x318   : > { %v1364_v4 = vpop.f32.mrb[8].mxu1  ;;  %v1410_v6 = vpop.f32.mrb[4].mxu0 }
 0x319   : > { %v1418_v7 = vmul.f32 0.35355338, %v1364_v4  ;;  %v1419_v8 = vmul.f32 0.35355338, %v1410_v6  ;;  %v3627_v9 = vpop.f32.mrb[9].mxu1  ;;  %v3633_v10 = vpop.f32.mrb[5].mxu0 }
 0x31a   : > { %v1367_v11 = vpop.f32.mrb[10].mxu1  ;;  %v1413_v12 = vpop.f32.mrb[6].mxu0 }
 0x31b   : > { %v3628_v13 = vpop.f32.mrb[11].mxu1  ;;  %v3634_v14 = vpop.f32.mrb[7].mxu0  ;;  %v1423_v15 = vadd.f32 %v1419_v8, %v702_v53  ;;  %v1422_v16 = vadd.f32 %v1418_v7, %v702_v53 }
 0x31d   : > { %v1433_v17 = vsel %vm1231_vm2, %v1423_v15, -inf  ;;  %v1430_v18 = vsel %vm1231_vm2, %v1422_v16, -inf }
 0x31e   : > { %1434 = vmax.xlane.f32.xlu1 %v1433_v17  ;;  %1431 = vmax.xlane.f32.xlu0 %v1430_v18 }
 0x32f   : > { %798 = vrot.lane.b32.xlu1 %v4554_v5, %s4200_s22 }
 0x334   : > { %795 = vrot.lane.b32.xlu0 %v4554_v5, %s4201_s18  ;;  %s5078_s18 = sld [smem:[#allocation28_spill]] }
 0x3a3   : > { %v1429_v20 = vpop.xlane.xlu0 %1428  ;;  %v1426_v21 = vpop.xlane.xlu1 %1425 }
 0x3a4   : > { %v1437_v22 = vsub.f32 %v1421_v62, %v1429_v20  ;;  %v1436_v23 = vsub.f32 %v1420_v63, %v1426_v21 }
 0x3a6   : > { %v1442_v24 = vmul.f32 1.442695, %v1437_v22  ;;  %v1440_v25 = vmul.f32 1.442695, %v1436_v23 }
 0x3a8   : > { %3895 = vpow2.f32 %v1442_v24 }
 0x3a9   : > { %3897 = vpow2.f32 %v1440_v25 }
 0x3ab   : > { %v1432_v31 = vpop.xlane.xlu0 %1431  ;;  %v1435_v32 = vpop.xlane.xlu1 %1434 }
 0x3ac   : > { %v1438_v33 = vsub.f32 %v1422_v16, %v1432_v31  ;;  %v1439_v34 = vsub.f32 %v1423_v15, %v1435_v32 }
 0x3ae   : > { %v1444_v35 = vmul.f32 1.442695, %v1438_v33  ;;  %v1446_v36 = vmul.f32 1.442695, %v1439_v34 }
 0x3af   : > { %v796_v41 = vpop.permute.xlu0 %795 }
 0x3b0   : > { %3899 = vpow2.f32 %v1444_v35 }
 0x3b1   : > { %3901 = vpow2.f32 %v1446_v36 }
 0x3b2   : > { %v4634_v27 = vpop.eup %3895 }
 0x3b3   : > { %v4636_v28 = vpop.eup %3897  ;;  %v1451_v29 = vsel %vm1231_vm2, %v4634_v27, 0.0 }
 0x3b4   : > { %1452 = vadd.xlane.f32.xlu1 %v1451_v29  ;;  %v1448_v30 = vsel %vm1231_vm2, %v4636_v28, 0.0 }
 0x3b5   : > { %1449 = vadd.xlane.f32.xlu0 %v1448_v30 }
 0x3ba   : > { %v4644_v37 = vpop.eup %3899 }
 0x3bb   : > { %v4646_v38 = vpop.eup %3901  ;;  %v1454_v39 = vsel %vm1231_vm2, %v4644_v37, 0.0 }
 0x3bc   : > { %v1457_v40 = vsel %vm1231_vm2, %v4646_v38, 0.0 }
 0x3c5   : > { %801 = vrot.lane.b32.xlu1 %v4554_v5, %s4202_s2  ;;  %s698_s2 = scalar_lea.vmem %s5078_s18, %s3471_s27 }
 0x3cb   : > { %804 = vrot.lane.b32.xlu0 %v4554_v5, %s4203_s19  ;;  %v799_v5 = vpop.permute.xlu1 %798 }
 0x3e9   : > { %1455 = vadd.xlane.f32.xlu1 %v1454_v39 }
 0x3ea   : > { %1458 = vadd.xlane.f32.xlu0 %v1457_v40 }
 0x441   : > { %v1453_v42 = vpop.xlane.xlu1 %1452 }
 0x442   : > { %v1450_v43 = vpop.xlane.xlu0 %1449  ;;  %3903 = vrcp.f32 %v1453_v42 }
 0x443   : > { %3905 = vrcp.f32 %v1450_v43 }
 0x445   : > { %v802_v44 = vpop.permute.xlu1 %801 }
 0x446   : > { %v943_v45 = vcombine.low %v796_v41, %v802_v44  ;;  %v944_v46 = vcombine.high %v796_v41, %v802_v44  ;;  %v805_v47 = vpop.permute.xlu0 %804 }
 0x447   : > { %v959_v48 = vcombine.low %v799_v5, %v805_v47  ;;  %v960_v49 = vcombine.high %v799_v5, %v805_v47 }
 0x448   : > { %v951_v50 = vrot.slane %v943_v45, %v4570_v19  ;;  %v958_v51 = vrot.slane %v944_v46, %v4570_v19 }
 0x449   : > { %v967_v52 = vrot.slane %v959_v48, %v4570_v19  ;;  %v974_v53 = vrot.slane %v960_v49, %v4570_v19 }
 0x44b   : > { %v975_v54 = vcombine.low %v951_v50, %v967_v52  ;;  %v976_v55 = vcombine.high %v951_v50, %v967_v52  ;;  %v991_v56 = vcombine.low %v958_v51, %v974_v53  ;;  %v992_v57 = vcombine.high %v958_v51, %v974_v53 }
 0x44c   : > { %v3904_v15 = vpop.eup %3903 }
 0x44d   : > { %v983_v58 = vrot.slane %v975_v54, %v4572_v26  ;;  %v990_v59 = vrot.slane %v976_v55, %v4572_v26  ;;  %v999_v60 = vrot.slane %v991_v56, %v4572_v26  ;;  %v1006_v61 = vrot.slane %v992_v57, %v4572_v26  ;;  %v3906_v18 = vpop.eup %3905 }
 0x44e   : > { %v1465_v24 = vmul.f32 %v3904_v15, %v4634_v27  ;;  %v1464_v25 = vmul.f32 %v3906_v18, %v4636_v28 }
 0x44f   : > { %v1147_v62 = vcombine.low %v983_v58, %v990_v59  ;;  %v3484_v63 = vcombine.high %v983_v58, %v990_v59  ;;  %v1163_v1 = vcombine.low %v999_v60, %v1006_v61  ;;  %v3485_v2 = vcombine.high %v999_v60, %v1006_v61 }
 0x450   : > { %v1468_v35 = vpack.c.bf16 %v1464_v25, %v1464_v25  ;;  %v1469_v36 = vpack.c.bf16 %v1465_v24, %v1465_v24 }
 0x451   : > { %v1154_v4 = vrot.slane %v1147_v62, %v4570_v19  ;;  %v1162_v6 = vrot.slane %v3484_v63, %v4570_v19  ;;  %v1170_v7 = vrot.slane %v1163_v1, %v4570_v19  ;;  %v1178_v8 = vrot.slane %v3485_v2, %v4570_v19 }
 0x453   : > { %v1179_v9 = vcombine.low %v1154_v4, %v1162_v6  ;;  %v1180_v10 = vcombine.high %v1154_v4, %v1162_v6  ;;  %v1195_v11 = vcombine.low %v1170_v7, %v1178_v8  ;;  %v1196_v12 = vcombine.high %v1170_v7, %v1178_v8 }
 0x455   : > { %v1187_v13 = vrot.slane %v1179_v9, %v4572_v26  ;;  %v1194_v14 = vrot.slane %v1180_v10, %v4572_v26  ;;  %v1203_v16 = vrot.slane %v1195_v11, %v4572_v26  ;;  %v1210_v17 = vrot.slane %v1196_v12, %v4572_v26  ;;  %v3881_v11 = vld [vmem:[#allocation7] sm:$0xff]  }
 0x457   : > { %v1211_v20 = vcombine.low %v1187_v13, %v1203_v16  ;;  %v1212_v21 = vcombine.high %v1187_v13, %v1203_v16  ;;  %v1213_v22 = vcombine.low %v1194_v14, %v1210_v17  ;;  %v1214_v23 = vcombine.high %v1194_v14, %v1210_v17 }
 0x459   : > { %v1223_v29 = vpack.c.bf16 %v1211_v20, %v1211_v20  ;;  %v1224_v30 = vpack.c.bf16 %v1212_v21, %v1212_v21  ;;  %v1225_v33 = vpack.c.bf16 %v1213_v22, %v1213_v22  ;;  %v1226_v34 = vpack.c.bf16 %v1214_v23, %v1214_v23  ;;  %v3882_v21 = vld [vmem:[#allocation7 + $0x8] sm:$0xff]  }
 0x45b   : > { %v1477_v31 = vsel %vm1475_vm3, %v1223_v29, 0  ;;  %v1523_v32 = vsel %vm1475_vm3, %v1224_v30, 0  ;;  %v1569_v27 = vsel %vm1475_vm3, %v1225_v33, 0  ;;  %v1615_v28 = vsel %vm1475_vm3, %v1226_v34, 0 }
 0x45c   : > { %3636 = vmatpush3.bf16.msra.mxu1 %v1477_v31  ;;  %3642 = vmatpush3.bf16.msra.mxu0 %v1523_v32 }
 0x45d   : > { %3647 = vmatprep.subr.bf16.mxu1 %v4189_v0  ;;  %3653 = vmatprep.subr.bf16.mxu0 %v4189_v0 }
 0x45f   : > { %3638 = vmatmul.mubr.msk.bf16.vlgmr.msra.gmra.mrb[12].mxu1 %vm1231_vm2, %v1468_v35  ;;  %3644 = vmatmul.mubr.msk.bf16.vlgmr.msra.gmra.mrb[8].mxu0 %vm1231_vm2, %v1469_v36 }
 0x460   : > { %3648 = vmatpush3.bf16.msra.mxu1 %v1569_v27  ;;  %3654 = vmatpush3.bf16.msra.mxu0 %v1615_v28 }
 0x461   : > { %3649 = vmatprep.mubr.msk.bf16.mxu1 %vm4190_vm0, %v4189_v0  ;;  %3655 = vmatprep.mubr.msk.bf16.mxu0 %vm4190_vm0, %v4189_v0 }
 0x462   : > { %3659 = vmatprep.subr.bf16.mxu1 %v4189_v0  ;;  %3667 = vmatprep.subr.bf16.mxu0 %v4189_v0 }
 0x476   : > { %v1456_v39 = vpop.xlane.xlu1 %1455 }
 0x477   : > { %3907 = vrcp.f32 %v1456_v39  ;;  %v1459_v40 = vpop.xlane.xlu0 %1458 }
 0x478   : > { %3909 = vrcp.f32 %v1459_v40 }
 0x481   : > { %v3908_v5 = vpop.eup %3907 }
 0x482   : > { %v3910_v41 = vpop.eup %3909  ;;  %v1466_v42 = vmul.f32 %v3908_v5, %v4644_v37 }
 0x483   : > { %v1467_v43 = vmul.f32 %v3910_v41, %v4646_v38 }
 0x484   : > { %v1470_v44 = vpack.c.bf16 %v1466_v42, %v1466_v42 }
 0x485   : > { %v1471_v45 = vpack.c.bf16 %v1467_v43, %v1467_v43 }
 0x486   : > { %3650 = vmatmul.mubr.msk.bf16.vlgmr.msra.gmra.mrb[16].mxu1 %vm1231_vm2, %v1470_v44 }
 0x487   : > { %3656 = vmatmul.mubr.msk.bf16.vlgmr.msra.gmra.mrb[12].mxu0 %vm1231_vm2, %v1471_v45  ;;  %3663 = vmatprep.mubr.msk.bf16.mxu1 %vm4190_vm0, %v4189_v0 }
 0x488   : > { %3671 = vmatprep.mubr.msk.bf16.mxu0 %vm4190_vm0, %v4189_v0  ;;  %3660 = vmatpush3.bf16.msra.mxu1 %v3881_v11 }
 0x489   : > { %3661 = vmatprep.subr.bf16.mxu1 %v4189_v0 }
 0x48c   : > { %3662 = vmatpush3.bf16.msra.mxu1 %v3882_v21 }
 0x48d   : > { %3675 = vmatprep.subr.bf16.mxu1 %v4189_v0 }
 0x532   : > { %v1513_v46 = vpop.f32.mrb[12].mxu1  ;;  %v1559_v47 = vpop.f32.mrb[8].mxu0 }
 0x533   : > { %v3639_v48 = vpop.f32.mrb[13].mxu1  ;;  %v3645_v49 = vpop.f32.mrb[9].mxu0 }
 0x534   : > { %v1516_v50 = vpop.f32.mrb[14].mxu1  ;;  %v1562_v37 = vpop.f32.mrb[10].mxu0 }
 0x535   : > { %v3640_v51 = vpop.f32.mrb[15].mxu1  ;;  %v3646_v38 = vpop.f32.mrb[11].mxu0 }
 0x536   : > { %v3883_v38 = vld [vmem:[#allocation10] sm:$0xff]  }
 0x559   : > { %v1605_v52 = vpop.f32.mrb[16].mxu1 }
 0x55a   : > { %v1657_v53 = vcombine.low %v1513_v46, %v1605_v52  ;;  %v1658_v54 = vcombine.high %v1513_v46, %v1605_v52  ;;  %v1651_v55 = vpop.f32.mrb[12].mxu0  ;;  %v3651_v56 = vpop.f32.mrb[17].mxu1  ;;  %v3884_v52 = vld [vmem:[#allocation10 + $0x8] sm:$0xff]  }
 0x55b   : > { %v1673_v57 = vcombine.low %v1559_v47, %v1651_v55  ;;  %v1674_v58 = vcombine.high %v1559_v47, %v1651_v55  ;;  %v3657_v59 = vpop.f32.mrb[13].mxu0  ;;  %v1608_v60 = vpop.f32.mrb[18].mxu1 }
 0x55c   : > { %v1665_v61 = vrot.slane %v1657_v53, %v4570_v19  ;;  %v1672_v62 = vrot.slane %v1658_v54, %v4570_v19  ;;  %v1654_v63 = vpop.f32.mrb[14].mxu0  ;;  %v3652_v1 = vpop.f32.mrb[19].mxu1  ;;  %v701_v53 = vld [vmem:[%s698_s2] sm:$0xff]  ;;  %v3886_v60 = vld [vmem:[#allocation8 + $0x8] sm:$0xff]   ;;  %s5082_s2 = sld [smem:[#allocation33_spill]] }
 0x55d   : > { %v1681_v2 = vrot.slane %v1673_v57, %v4570_v19  ;;  %v1688_v4 = vrot.slane %v1674_v58, %v4570_v19  ;;  %v3658_v6 = vpop.f32.mrb[15].mxu0  ;;  %v1955_v54 = vpack.c.bf16 %v701_v53, %v701_v53  ;;  %v3885_v59 = vld [vmem:[#allocation8] sm:$0xff]  }
 0x55e   : > { %3668 = vmatpush3.bf16.msra.mxu0 %v3885_v59 }
 0x55f   : > { %v1689_v7 = vcombine.low %v1665_v61, %v1681_v2  ;;  %v1690_v8 = vcombine.high %v1665_v61, %v1681_v2  ;;  %v1705_v9 = vcombine.low %v1672_v62, %v1688_v4  ;;  %v1706_v10 = vcombine.high %v1672_v62, %v1688_v4  ;;  %3669 = vmatprep.subr.bf16.mxu0 %v4189_v0 }
 0x561   : > { %v1697_v12 = vrot.slane %v1689_v7, %v4572_v26  ;;  %v1704_v13 = vrot.slane %v1690_v8, %v4572_v26  ;;  %v1713_v14 = vrot.slane %v1705_v9, %v4572_v26  ;;  %v1720_v15 = vrot.slane %v1706_v10, %v4572_v26  ;;  %v3499_v8 = vld [vmem:[%s5014_s13] ss:$0 sm:$0xff] }
 0x562   : > { %3670 = vmatpush3.bf16.msra.mxu0 %v3886_v60  ;;  %v3500_v10 = vld [vmem:[%s5015_s14] ss:$0 sm:$0xff] }
 0x563   : > { %v1725_v16 = vcombine.low %v1697_v12, %v1704_v13  ;;  %v3494_v17 = vcombine.high %v1697_v12, %v1704_v13  ;;  %v1741_v18 = vcombine.low %v1713_v14, %v1720_v15  ;;  %v3495_v20 = vcombine.high %v1713_v14, %v1720_v15  ;;  %3683 = vmatprep.subr.bf16.mxu0 %v4189_v0 }
 0x565   : > { %v1732_v22 = vrot.slane %v1725_v16, %v4570_v19  ;;  %v1740_v23 = vrot.slane %v3494_v17, %v4570_v19  ;;  %v1748_v24 = vrot.slane %v1741_v18, %v4570_v19  ;;  %v1756_v25 = vrot.slane %v3495_v20, %v4570_v19 }
 0x567   : > { %v1758_v29 = vcombine.high %v1732_v22, %v1740_v23  ;;  %v1774_v30 = vcombine.high %v1748_v24, %v1756_v25  ;;  %v1757_v31 = vcombine.low %v1732_v22, %v1740_v23  ;;  %v1773_v32 = vcombine.low %v1748_v24, %v1756_v25 }
 0x569   : > { %v1772_v33 = vrot.slane %v1758_v29, %v4572_v26  ;;  %v1788_v34 = vrot.slane %v1774_v30, %v4572_v26  ;;  %v1765_v35 = vrot.slane %v1757_v31, %v4572_v26  ;;  %v1781_v36 = vrot.slane %v1773_v32, %v4572_v26 }
 0x56b   : > { %v1791_v27 = vcombine.low %v1772_v33, %v1788_v34  ;;  %v1790_v28 = vcombine.high %v1765_v35, %v1781_v36  ;;  %v1792_v39 = vcombine.high %v1772_v33, %v1788_v34  ;;  %v1789_v40 = vcombine.low %v1765_v35, %v1781_v36 }
 0x56d   : > { %1798 = vrot.lane.b32.xlu1 %v1791_v27, %s4204_s26  ;;  %1794 = vrot.lane.b32.xlu0 %v1790_v28, %s4205_s25 }
 0x571   : > { %1802 = vrot.lane.b32.xlu1 %v1792_v39, %s4206_s0 }
 0x5df   : > { %v1799_v5 = vpop.permute.xlu1 %1798  ;;  %v1795_v41 = vpop.permute.xlu0 %1794 }
 0x5e0   : > { %v1805_v42 = vsel %vm1231_vm2, %v1789_v40, %v1795_v41 }
 0x5e1   : > { %v1807_v44 = vsel %vm1806_vm4, %v1805_v42, %v1799_v5 }
 0x5e3   : > { %v1803_v43 = vpop.permute.xlu1 %1802 }
 0x5e4   : > { %v1809_v45 = vsel %vm1808_vm5, %v1807_v44, %v1803_v43 }
 0x5e5   : > { %v1810_v46 = vpack.c.bf16 %v1809_v45, %v1809_v45 }
 0x5e7   : > { %3664 = vmatmul.mubr.msk.bf16.vlgmr.msra.gmra.mrb[20].mxu1 %vm729_vm1, %v1810_v46 }
 0x5e8   : > { %3679 = vmatprep.mubr.msk.bf16.mxu1 %vm4190_vm0, %v4189_v0  ;;  %3676 = vmatpush3.bf16.msra.mxu1 %v3883_v38 }
 0x5e9   : > { %3677 = vmatprep.subr.bf16.mxu1 %v4189_v0 }
 0x5ec   : > { %3678 = vmatpush3.bf16.msra.mxu1 %v3884_v52 }
 0x5ed   : > { %3689 = vmatprep.subr.bf16.mxu1 %v4189_v0 }
 0x5ef   : > { %3680 = vmatmul.mubr.msk.bf16.vlgmr.msra.gmra.mrb[24].mxu1 %vm729_vm1, %v1955_v54 }
 0x5f0   : > { %3691 = vmatprep.mubr.msk.bf16.mxu1 %vm4190_vm0, %v4189_v0 }
 0x6ba   : > { %v1860_v47 = vpop.f32.mrb[20].mxu1 }
 0x6bb   : > { %v1866_v48 = vadd.f32 %v1860_v47, %v4545_v3  ;;  %v3665_v49 = vpop.f32.mrb[21].mxu1 }
 0x6bc   : > { %v1863_v50 = vpop.f32.mrb[22].mxu1 }
 0x6bd   : > { %v3666_v37 = vpop.f32.mrb[23].mxu1  ;;  %v1867_v51 = vsel %vm729_vm1, %v1866_v48, 0.0 }
 0x6be   : > { %1868 = vadd.xlane.f32.xlu0 %v1867_v51 }
 0x6c2   : > { %v4734_v61 = vpop.f32.mrb[24].mxu1 }
 0x6c3   : > { %v3681_v62 = vpop.f32.mrb[25].mxu1 }
 0x6c4   : > { %v2012_v63 = vpop.f32.mrb[26].mxu1 }
 0x6c5   : > { %v3682_v1 = vpop.f32.mrb[27].mxu1 }
 0x6d4   : > { %2166 = vrot.lane.b32.xlu0 %v4734_v61, %s4196_s5 }
 0x6d8   : > { %2172 = vrot.lane.b32.xlu0 %v4734_v61, %s4197_s30 }
 0x74b   : > { %v1869_v3 = vpop.xlane.xlu0 %1868 }
 0x74c   : > { %v1871_v55 = vmul.f32 0.03125, %v1869_v3 }
 0x74e   : > { %v1872_v56 = vsub.f32 %v1866_v48, %v1871_v55 }
 0x74f   : > { %v2167_v14 = vpop.permute.xlu0 %2166 }
 0x750   : > { %v1873_v57 = vmul.f32 %v1872_v56, %v1872_v56 }
 0x752   : > { %v1874_v58 = vsel %vm729_vm1, %v1873_v57, 0.0 }
 0x753   : > { %1875 = vadd.xlane.f32.xlu1 %v1874_v58  ;;  %v2173_v16 = vpop.permute.xlu0 %2172 }
 0x754   : > { %v2203_v20 = vcombine.low %v2167_v14, %v2173_v16  ;;  %v2204_v21 = vcombine.high %v2167_v14, %v2173_v16 }
 0x756   : > { %v2211_v24 = vrot.slane %v2203_v20, %v4570_v19  ;;  %v2218_v25 = vrot.slane %v2204_v21, %v4570_v19 }
 0x764   : > { %2169 = vrot.lane.b32.xlu1 %v4734_v61, %s4195_s28 }
 0x7e0   : > { %v1876_v2 = vpop.xlane.xlu1 %1875 }
 0x7e1   : > { %v1877_v4 = vmul.f32 0.03125, %v1876_v2 }
 0x7e3   : > { %v1878_v6 = vadd.f32 1e-05, %v1877_v4 }
 0x7e4   : > { %v2170_v15 = vpop.permute.xlu1 %2169 }
 0x7e5   : > { %3911 = vrsqrt.f32 %v1878_v6  ;;  %v2187_v17 = vcombine.low %v4734_v61, %v2170_v15  ;;  %v2188_v18 = vcombine.high %v4734_v61, %v2170_v15 }
 0x7e7   : > { %v2195_v22 = vrot.slane %v2187_v17, %v4570_v19  ;;  %v2202_v23 = vrot.slane %v2188_v18, %v4570_v19 }
 0x7e9   : > { %v2251_v29 = vcombine.low %v2195_v22, %v2211_v24  ;;  %v2252_v30 = vcombine.high %v2195_v22, %v2211_v24  ;;  %v2267_v31 = vcombine.low %v2202_v23, %v2218_v25  ;;  %v2268_v32 = vcombine.high %v2202_v23, %v2218_v25 }
 0x7eb   : > { %v2259_v33 = vrot.slane %v2251_v29, %v4572_v26  ;;  %v2266_v34 = vrot.slane %v2252_v30, %v4572_v26  ;;  %v2275_v35 = vrot.slane %v2267_v31, %v4572_v26  ;;  %v2282_v36 = vrot.slane %v2268_v32, %v4572_v26 }
 0x7ed   : > { %v3509_v27 = vcombine.low %v2259_v33, %v2266_v34  ;;  %v3511_v28 = vcombine.high %v2259_v33, %v2266_v34  ;;  %v3513_v39 = vcombine.low %v2275_v35, %v2282_v36  ;;  %v3515_v40 = vcombine.high %v2275_v35, %v2282_v36 }
 0x7ef   : > { %v3912_v7 = vpop.eup %3911  ;;  %v2331_v5 = vrot.slane %v3509_v27, %v4570_v19  ;;  %v2347_v41 = vrot.slane %v3511_v28, %v4570_v19  ;;  %v2363_v42 = vrot.slane %v3513_v39, %v4570_v19  ;;  %v2379_v43 = vrot.slane %v3515_v40, %v4570_v19 }
 0x7f0   : > { %v1880_v9 = vmul.f32 %v3912_v7, %v1872_v56 }
 0x7f1   : > { %v2387_v44 = vcombine.low %v2331_v5, %v2347_v41  ;;  %v2419_v45 = vcombine.low %v2363_v42, %v2379_v43  ;;  %v2388_v46 = vcombine.high %v2331_v5, %v2347_v41  ;;  %v2420_v47 = vcombine.high %v2363_v42, %v2379_v43 }
 0x7f2   : > { %v1887_v11 = vmul.f32 %v3499_v8, %v1880_v9 }
 0x7f3   : > { %v2395_v48 = vrot.slane %v2387_v44, %v4572_v26  ;;  %v2427_v49 = vrot.slane %v2419_v45, %v4572_v26  ;;  %v2402_v50 = vrot.slane %v2388_v46, %v4572_v26  ;;  %v2434_v37 = vrot.slane %v2420_v47, %v4572_v26 }
 0x7f4   : > { %v4748_v12 = vadd.f32 %v3500_v10, %v1887_v11 }
 0x7f5   : > { %v2451_v51 = vcombine.low %v2395_v48, %v2427_v49  ;;  %v2452_v38 = vcombine.high %v2395_v48, %v2427_v49  ;;  %v2453_v52 = vcombine.low %v2402_v50, %v2434_v37  ;;  %v2454_v53 = vcombine.high %v2402_v50, %v2434_v37 }
 0x7f6   : > { %v1895_v13 = vpack.c.bf16 %v4748_v12, %v4748_v12 }
 0x7f7   : > { %v2459_v54 = vpack.c.bf16 %v2451_v51, %v2451_v51  ;;  %v2460_v3 = vpack.c.bf16 %v2452_v38, %v2452_v38  ;;  %v2461_v5 = vpack.c.bf16 %v2453_v52, %v2453_v52  ;;  %v2462_v41 = vpack.c.bf16 %v2454_v53, %v2454_v53  ;;  %v703_v52 = vld [vmem:[#allocation5] sm:$0xff] }
 0x7f8   : > { %3672 = vmatmul.mubr.msk.bf16.vlgmr.msra.gmra.mrb[16].mxu0 %vm729_vm1, %v1895_v13 }
 0x7f9   : > { %3685 = vmatprep.mubr.msk.bf16.mxu0 %vm4190_vm0, %v4189_v0  ;;  %v2475_v55 = vsel %vm1231_vm2, %v2459_v54, 0  ;;  %v2521_v56 = vsel %vm1231_vm2, %v2460_v3, 0  ;;  %v2567_v46 = vsel %vm1231_vm2, %v2461_v5, 0  ;;  %v2613_v47 = vsel %vm1231_vm2, %v2462_v41, 0 }
 0x7fa   : > { %3684 = vmatpush3.bf16.xpose.msra.mxu0 %v2475_v55  ;;  %3690 = vmatpush3.bf16.xpose.msra.mxu1 %v2521_v56 }
 0x7fb   : > { %3695 = vmatprep.subr.bf16.mxu0 %v4189_v0  ;;  %3701 = vmatprep.subr.bf16.mxu1 %v4189_v0 }
 0x8cb   : > { %v1949_v57 = vpop.f32.mrb[16].mxu0 }
 0x8cc   : > { %v3673_v58 = vpop.f32.mrb[17].mxu0  ;;  %2016 = vrot.lane.b32.xlu1 %v1949_v57, %s4196_s5  ;;  %2019 = vrot.lane.b32.xlu0 %v1949_v57, %s4195_s28 }
 0x8cd   : > { %v1952_v59 = vpop.f32.mrb[18].mxu0 }
 0x8ce   : > { %v3674_v60 = vpop.f32.mrb[19].mxu0 }
 0x8d0   : > { %2022 = vrot.lane.b32.xlu1 %v1949_v57, %s4197_s30  ;;  %s5080_s30 = sld [smem:[#allocation25_spill]] }
 0x8d6   : > { %p5084_p7 = scmp.ne.s32.totalorder %s5080_s30, 0 }
 0x93e   : > { %v2017_v62 = vpop.permute.xlu1 %2016  ;;  %v2020_v63 = vpop.permute.xlu0 %2019 }
 0x93f   : > { %v2025_v1 = vcombine.low %v1949_v57, %v2020_v63  ;;  %v2026_v2 = vcombine.high %v1949_v57, %v2020_v63 }
 0x941   : > { %v2033_v8 = vrot.slane %v2025_v1, %v4570_v19  ;;  %v2040_v9 = vrot.slane %v2026_v2, %v4570_v19 }
 0x942   : > { %v2023_v4 = vpop.permute.xlu1 %2022 }
 0x943   : > { %v2041_v6 = vcombine.low %v2017_v62, %v2023_v4  ;;  %v2042_v7 = vcombine.high %v2017_v62, %v2023_v4 }
 0x945   : > { %v2049_v10 = vrot.slane %v2041_v6, %v4570_v19  ;;  %v2056_v11 = vrot.slane %v2042_v7, %v4570_v19 }
 0x947   : > { %v2057_v13 = vcombine.low %v2033_v8, %v2049_v10  ;;  %v2058_v14 = vcombine.high %v2033_v8, %v2049_v10  ;;  %v2073_v15 = vcombine.low %v2040_v9, %v2056_v11  ;;  %v2074_v16 = vcombine.high %v2040_v9, %v2056_v11 }
 0x949   : > { %v2065_v17 = vrot.slane %v2057_v13, %v4572_v26  ;;  %v2072_v18 = vrot.slane %v2058_v14, %v4572_v26  ;;  %v2081_v20 = vrot.slane %v2073_v15, %v4572_v26  ;;  %v2088_v21 = vrot.slane %v2074_v16, %v4572_v26 }
 0x94b   : > { %v2093_v22 = vcombine.low %v2065_v17, %v2072_v18  ;;  %v3507_v23 = vcombine.high %v2065_v17, %v2072_v18  ;;  %v2109_v24 = vcombine.low %v2081_v20, %v2088_v21  ;;  %v3508_v25 = vcombine.high %v2081_v20, %v2088_v21 }
 0x94d   : > { %v2100_v29 = vrot.slane %v2093_v22, %v4570_v19  ;;  %v2108_v30 = vrot.slane %v3507_v23, %v4570_v19  ;;  %v2116_v31 = vrot.slane %v2109_v24, %v4570_v19  ;;  %v2124_v32 = vrot.slane %v3508_v25, %v4570_v19 }
 0x94f   : > { %v2125_v33 = vcombine.low %v2100_v29, %v2108_v30  ;;  %v2141_v34 = vcombine.low %v2116_v31, %v2124_v32  ;;  %v2126_v35 = vcombine.high %v2100_v29, %v2108_v30  ;;  %v2142_v36 = vcombine.high %v2116_v31, %v2124_v32 }
 0x951   : > { %v2133_v27 = vrot.slane %v2125_v33, %v4572_v26  ;;  %v2149_v28 = vrot.slane %v2141_v34, %v4572_v26  ;;  %v2140_v44 = vrot.slane %v2126_v35, %v4572_v26  ;;  %v2156_v45 = vrot.slane %v2142_v36, %v4572_v26 }
 0x953   : > { %v2157_v39 = vcombine.low %v2133_v27, %v2149_v28  ;;  %v2158_v40 = vcombine.high %v2133_v27, %v2149_v28  ;;  %v2159_v48 = vcombine.low %v2140_v44, %v2156_v45  ;;  %v2160_v49 = vcombine.high %v2140_v44, %v2156_v45 }
 0x955   : > { %v2161_v42 = vpack.c.bf16 %v2157_v39, %v2157_v39  ;;  %v2162_v43 = vpack.c.bf16 %v2158_v40, %v2158_v40  ;;  %v2163_v50 = vpack.c.bf16 %v2159_v48, %v2159_v48  ;;  %v2164_v37 = vpack.c.bf16 %v2160_v49, %v2160_v49 }
 0x957   : > { %3686 = vmatmul.mubr.msk.bf16.vlgmr.msra.gmra.mrb[20].mxu0 %vm1231_vm2, %v2161_v42  ;;  %3692 = vmatmul.mubr.msk.bf16.vlgmr.msra.gmra.mrb[28].mxu1 %vm1231_vm2, %v2162_v43 }
 0x958   : > { %3696 = vmatpush3.bf16.xpose.msra.mxu0 %v2567_v46  ;;  %3702 = vmatpush3.bf16.xpose.msra.mxu1 %v2613_v47 }
 0x959   : > { %3697 = vmatprep.mubr.msk.bf16.mxu0 %vm4190_vm0, %v4189_v0  ;;  %3703 = vmatprep.mubr.msk.bf16.mxu1 %vm4190_vm0, %v4189_v0 }
 0x95a   : > { %3707 = vmatprep.subr.bf16.mxu0 %v4189_v0  ;;  %3713 = vmatprep.subr.bf16.mxu1 %v4189_v0 }
 0x95f   : > { %3698 = vmatmul.mubr.msk.bf16.vlgmr.msra.gmra.mrb[24].mxu0 %vm1231_vm2, %v2163_v50  ;;  %3704 = vmatmul.mubr.msk.bf16.vlgmr.msra.gmra.mrb[32].mxu1 %vm1231_vm2, %v2164_v37 }
 0x960   : > { %3709 = vmatprep.mubr.msk.bf16.mxu0 %vm4190_vm0, %v4189_v0  ;;  %3715 = vmatprep.mubr.msk.bf16.mxu1 %vm4190_vm0, %v4189_v0 }
 0xa2a   : > { %v2511_v51 = vpop.f32.mrb[20].mxu0  ;;  %v2557_v38 = vpop.f32.mrb[28].mxu1 }
 0xa2b   : > { %v2655_v53 = vmul.f32 0.35355338, %v2511_v51  ;;  %v2656_v54 = vmul.f32 0.35355338, %v2557_v38  ;;  %v3687_v3 = vpop.f32.mrb[21].mxu0  ;;  %v3693_v55 = vpop.f32.mrb[29].mxu1 }
 0xa2c   : > { %v2514_v56 = vpop.f32.mrb[22].mxu0  ;;  %v2560_v57 = vpop.f32.mrb[30].mxu1 }
 0xa2d   : > { %v3688_v58 = vpop.f32.mrb[23].mxu0  ;;  %v3694_v59 = vpop.f32.mrb[31].mxu1  ;;  %v2659_v60 = vadd.f32 %v2655_v53, %v703_v52  ;;  %v2660_v62 = vadd.f32 %v2656_v54, %v703_v52 }
 0xa2f   : > { %v2663_v63 = vsel %vm1231_vm2, %v2659_v60, -inf  ;;  %v2666_v1 = vsel %vm1231_vm2, %v2660_v62, -inf }
 0xa30   : > { %2664 = vmax.xlane.f32.xlu0 %v2663_v63  ;;  %2667 = vmax.xlane.f32.xlu1 %v2666_v1 }
 0xa32   : > { %v2603_v2 = vpop.f32.mrb[24].mxu0  ;;  %v2649_v4 = vpop.f32.mrb[32].mxu1 }
 0xa33   : > { %v2657_v6 = vmul.f32 0.35355338, %v2603_v2  ;;  %v2658_v7 = vmul.f32 0.35355338, %v2649_v4  ;;  %v3699_v8 = vpop.f32.mrb[25].mxu0  ;;  %v3705_v9 = vpop.f32.mrb[33].mxu1 }
 0xa34   : > { %v2606_v10 = vpop.f32.mrb[26].mxu0  ;;  %v2652_v11 = vpop.f32.mrb[34].mxu1 }
 0xa35   : > { %v3700_v13 = vpop.f32.mrb[27].mxu0  ;;  %v3706_v14 = vpop.f32.mrb[35].mxu1  ;;  %v2661_v15 = vadd.f32 %v2657_v6, %v703_v52  ;;  %v2662_v17 = vadd.f32 %v2658_v7, %v703_v52 }
 0xa37   : > { %v2669_v16 = vsel %vm1231_vm2, %v2661_v15, -inf  ;;  %v2672_v18 = vsel %vm1231_vm2, %v2662_v17, -inf }
 0xa38   : > { %2670 = vmax.xlane.f32.xlu0 %v2669_v16 }
 0xa3c   : > { %2673 = vmax.xlane.f32.xlu0 %v2672_v18 }
 0xa41   : > { %2175 = vrot.lane.b32.xlu1 %v4734_v61, %s4192_s24  ;;  %s5083_s24 = sld [smem:[#allocation34_spill]] }
 0xabd   : > { %v2665_v20 = vpop.xlane.xlu0 %2664  ;;  %v2668_v21 = vpop.xlane.xlu1 %2667 }
 0xabe   : > { %v2675_v22 = vsub.f32 %v2659_v60, %v2665_v20  ;;  %v2676_v23 = vsub.f32 %v2660_v62, %v2668_v21 }
 0xac0   : > { %v2679_v24 = vmul.f32 1.442695, %v2675_v22  ;;  %v2681_v25 = vmul.f32 1.442695, %v2676_v23 }
 0xac2   : > { %3913 = vpow2.f32 %v2679_v24 }
 0xac3   : > { %3915 = vpow2.f32 %v2681_v25 }
 0xac5   : > { %v2671_v33 = vpop.xlane.xlu0 %2670 }
 0xac6   : > { %v2677_v34 = vsub.f32 %v2661_v15, %v2671_v33 }
 0xac8   : > { %v2683_v27 = vmul.f32 1.442695, %v2677_v34 }
 0xac9   : > { %v2674_v35 = vpop.xlane.xlu0 %2673 }
 0xaca   : > { %v2678_v36 = vsub.f32 %v2662_v17, %v2674_v35  ;;  %3917 = vpow2.f32 %v2683_v27 }
 0xacc   : > { %v4818_v29 = vpop.eup %3913  ;;  %v2685_v28 = vmul.f32 1.442695, %v2678_v36 }
 0xacd   : > { %v4820_v30 = vpop.eup %3915  ;;  %v2687_v31 = vsel %vm1231_vm2, %v4818_v29, 0.0 }
 0xace   : > { %2688 = vadd.xlane.f32.xlu1 %v2687_v31  ;;  %v2690_v32 = vsel %vm1231_vm2, %v4820_v30, 0.0  ;;  %3919 = vpow2.f32 %v2685_v28 }
 0xacf   : > { %2691 = vadd.xlane.f32.xlu0 %v2690_v32 }
 0xad4   : > { %v4832_v39 = vpop.eup %3917 }
 0xad5   : > { %v2693_v5 = vsel %vm1231_vm2, %v4832_v39, 0.0 }
 0xad8   : > { %v4834_v40 = vpop.eup %3919 }
 0xad9   : > { %v2696_v41 = vsel %vm1231_vm2, %v4834_v40, 0.0 }
 0xadf   : > { %2181 = vrot.lane.b32.xlu1 %v4734_v61, %s4191_s21 }
 0xae3   : > { %2184 = vrot.lane.b32.xlu1 %v4734_v61, %s4193_s20  ;;  %s4958_s20 = scalar_lea.hbm %s5083_s24, %s3545_s17 }
 0xae5   : > { %2178 = vrot.lane.b32.xlu0 %v4734_v61, %s4194_s3  ;;  %v2176_v61 = vpop.permute.xlu1 %2175  ;;  %s5079_s3 = sld [smem:[#allocation20_spill]] }
 0xaeb   : > { %s688_s28 = sand.u32 1, %s5079_s3  }
 0xaec   : > { %s3470_s5 = sshll.u32 %s688_s28, 3  ;;  %s3310_s3 = scalar_lea.sflag [#allocation4], %s688_s28 }
 0xaed   : > { %s690_s27 = scalar_lea.vmem [#allocation13], %s3470_s5  ;;  %s4105_s5 = sshll.u32 %s4207_s1, 4  ;;  %s4106_s5 = int_to_ptr.vmem [resolvable:$false] %s4105_s5 }
 0xaee   : > { %s3323_s19 = sshll.u32 %s690_s27, 4  ;;  %s4960_s19 = int_to_ptr.vmem [resolvable:$true] %s3323_s19 }
 0xaef   : > { %p4108_p13 = scmp.lt.s32.totalorder %s4960_s19, %s4106_s5 }
 0xb04   : > { %2694 = vadd.xlane.f32.xlu0 %v2693_v5 }
 0xb07   : > { %2697 = vadd.xlane.f32.xlu1 %v2696_v41 }
 0xb5b   : > { %v2689_v42 = vpop.xlane.xlu1 %2688 }
 0xb5c   : > { %v2692_v43 = vpop.xlane.xlu0 %2691  ;;  %3921 = vrcp.f32 %v2689_v42 }
 0xb5d   : > { %3923 = vrcp.f32 %v2692_v43 }
 0xb5f   : > { %v2182_v44 = vpop.permute.xlu1 %2181 }
 0xb60   : > { %v2219_v45 = vcombine.low %v2176_v61, %v2182_v44  ;;  %v2220_v46 = vcombine.high %v2176_v61, %v2182_v44  ;;  %v2179_v47 = vpop.permute.xlu0 %2178 }
 0xb62   : > { %v2227_v37 = vrot.slane %v2219_v45, %v4570_v19  ;;  %v2234_v51 = vrot.slane %v2220_v46, %v4570_v19 }
 0xb63   : > { %v2185_v48 = vpop.permute.xlu1 %2184 }
 0xb64   : > { %v2235_v49 = vcombine.low %v2179_v47, %v2185_v48  ;;  %v2236_v50 = vcombine.high %v2179_v47, %v2185_v48 }
 0xb66   : > { %v2243_v38 = vrot.slane %v2235_v49, %v4570_v19  ;;  %v2250_v52 = vrot.slane %v2236_v50, %v4570_v19  ;;  %v3922_v15 = vpop.eup %3921 }
 0xb67   : > { %v3924_v18 = vpop.eup %3923  ;;  %v2703_v24 = vmul.f32 %v3922_v15, %v4818_v29 }
 0xb68   : > { %v2283_v53 = vcombine.low %v2227_v37, %v2243_v38  ;;  %v2284_v54 = vcombine.high %v2227_v37, %v2243_v38  ;;  %v2299_v3 = vcombine.low %v2234_v51, %v2250_v52  ;;  %v2300_v55 = vcombine.high %v2234_v51, %v2250_v52 }
 0xb69   : > { %v2704_v25 = vmul.f32 %v3924_v18, %v4820_v30  ;;  %v2707_v27 = vpack.c.bf16 %v2703_v24, %v2703_v24 }
 0xb6a   : > { %v2291_v56 = vrot.slane %v2283_v53, %v4572_v26  ;;  %v2298_v57 = vrot.slane %v2284_v54, %v4572_v26  ;;  %v2307_v58 = vrot.slane %v2299_v3, %v4572_v26  ;;  %v2314_v59 = vrot.slane %v2300_v55, %v4572_v26 }
 0xb6b   : > { %v2708_v28 = vpack.c.bf16 %v2704_v25, %v2704_v25 }
 0xb6c   : > { %v3510_v60 = vcombine.low %v2291_v56, %v2298_v57  ;;  %v3512_v62 = vcombine.high %v2291_v56, %v2298_v57  ;;  %v3514_v63 = vcombine.low %v2307_v58, %v2314_v59  ;;  %v3516_v1 = vcombine.high %v2307_v58, %v2314_v59 }
 0xb6e   : > { %v2338_v2 = vrot.slane %v3510_v60, %v4570_v19  ;;  %v2354_v4 = vrot.slane %v3512_v62, %v4570_v19  ;;  %v2370_v6 = vrot.slane %v3514_v63, %v4570_v19  ;;  %v2386_v7 = vrot.slane %v3516_v1, %v4570_v19 }
 0xb70   : > { %v2403_v8 = vcombine.low %v2338_v2, %v2354_v4  ;;  %v2404_v9 = vcombine.high %v2338_v2, %v2354_v4  ;;  %v2435_v10 = vcombine.low %v2370_v6, %v2386_v7  ;;  %v2436_v11 = vcombine.high %v2370_v6, %v2386_v7 }
 0xb72   : > { %v2411_v13 = vrot.slane %v2403_v8, %v4572_v26  ;;  %v2418_v14 = vrot.slane %v2404_v9, %v4572_v26  ;;  %v2443_v16 = vrot.slane %v2435_v10, %v4572_v26  ;;  %v2450_v17 = vrot.slane %v2436_v11, %v4572_v26  ;;  %v3887_v10 = vld [vmem:[#allocation11] sm:$0xff]  }
 0xb74   : > { %v2455_v20 = vcombine.low %v2411_v13, %v2443_v16  ;;  %v2456_v21 = vcombine.high %v2411_v13, %v2443_v16  ;;  %v2457_v22 = vcombine.low %v2418_v14, %v2450_v17  ;;  %v2458_v23 = vcombine.high %v2418_v14, %v2450_v17 }
 0xb76   : > { %v2463_v31 = vpack.c.bf16 %v2455_v20, %v2455_v20  ;;  %v2464_v32 = vpack.c.bf16 %v2456_v21, %v2456_v21  ;;  %v2465_v35 = vpack.c.bf16 %v2457_v22, %v2457_v22  ;;  %v2466_v36 = vpack.c.bf16 %v2458_v23, %v2458_v23  ;;  %v3888_v21 = vld [vmem:[#allocation11 + $0x8] sm:$0xff]  }
 0xb78   : > { %v2715_v33 = vsel %vm1475_vm3, %v2463_v31, 0  ;;  %v2761_v34 = vsel %vm1475_vm3, %v2464_v32, 0  ;;  %v2807_v29 = vsel %vm1475_vm3, %v2465_v35, 0  ;;  %v2853_v30 = vsel %vm1475_vm3, %v2466_v36, 0 }
 0xb79   : > { %3708 = vmatpush3.bf16.msra.mxu0 %v2715_v33  ;;  %3714 = vmatpush3.bf16.msra.mxu1 %v2761_v34 }
 0xb7a   : > { %3719 = vmatprep.subr.bf16.mxu0 %v4189_v0  ;;  %3725 = vmatprep.subr.bf16.mxu1 %v4189_v0 }
 0xb7c   : > { %3710 = vmatmul.mubr.msk.bf16.vlgmr.msra.gmra.mrb[28].mxu0 %vm1231_vm2, %v2707_v27  ;;  %3716 = vmatmul.mubr.msk.bf16.vlgmr.msra.gmra.mrb[36].mxu1 %vm1231_vm2, %v2708_v28 }
 0xb7d   : > { %3720 = vmatpush3.bf16.msra.mxu0 %v2807_v29  ;;  %3726 = vmatpush3.bf16.msra.mxu1 %v2853_v30 }
 0xb7e   : > { %3721 = vmatprep.mubr.msk.bf16.mxu0 %vm4190_vm0, %v4189_v0  ;;  %3727 = vmatprep.mubr.msk.bf16.mxu1 %vm4190_vm0, %v4189_v0 }
 0xb7f   : > { %3731 = vmatprep.subr.bf16.mxu0 %v4189_v0  ;;  %3739 = vmatprep.subr.bf16.mxu1 %v4189_v0 }
 0xb91   : > { %v2695_v5 = vpop.xlane.xlu0 %2694 }
 0xb92   : > { %3925 = vrcp.f32 %v2695_v5 }
 0xb94   : > { %v2698_v41 = vpop.xlane.xlu1 %2697 }
 0xb95   : > { %3927 = vrcp.f32 %v2698_v41 }
 0xb9c   : > { %v3926_v61 = vpop.eup %3925 }
 0xb9d   : > { %v2705_v42 = vmul.f32 %v3926_v61, %v4832_v39 }
 0xb9f   : > { %v3928_v43 = vpop.eup %3927  ;;  %v2709_v44 = vpack.c.bf16 %v2705_v42, %v2705_v42 }
 0xba0   : > { %v2706_v45 = vmul.f32 %v3928_v43, %v4834_v40 }
 0xba1   : > { %3722 = vmatmul.mubr.msk.bf16.vlgmr.msra.gmra.mrb[32].mxu0 %vm1231_vm2, %v2709_v44 }
 0xba2   : > { %v2710_v46 = vpack.c.bf16 %v2706_v45, %v2706_v45  ;;  %3735 = vmatprep.mubr.msk.bf16.mxu0 %vm4190_vm0, %v4189_v0  ;;  %3732 = vmatpush3.bf16.msra.mxu0 %v3887_v10 }
 0xba3   : > { %3733 = vmatprep.subr.bf16.mxu0 %v4189_v0 }
 0xba4   : > { %3728 = vmatmul.mubr.msk.bf16.vlgmr.msra.gmra.mrb[40].mxu1 %vm1231_vm2, %v2710_v46 }
 0xba5   : > { %3743 = vmatprep.mubr.msk.bf16.mxu1 %vm4190_vm0, %v4189_v0 }
 0xba6   : > { %3734 = vmatpush3.bf16.msra.mxu0 %v3888_v21 }
 0xba7   : > { %3747 = vmatprep.subr.bf16.mxu0 %v4189_v0 }
 0xc4f   : > { %v2751_v47 = vpop.f32.mrb[28].mxu0  ;;  %v2797_v48 = vpop.f32.mrb[36].mxu1 }
 0xc50   : > { %v3711_v49 = vpop.f32.mrb[29].mxu0  ;;  %v3717_v50 = vpop.f32.mrb[37].mxu1 }
 0xc51   : > { %v2754_v39 = vpop.f32.mrb[30].mxu0  ;;  %v2800_v37 = vpop.f32.mrb[38].mxu1 }
 0xc52   : > { %v3712_v51 = vpop.f32.mrb[31].mxu0  ;;  %v3718_v38 = vpop.f32.mrb[39].mxu1 }
 0xc74   : > { %v2843_v40 = vpop.f32.mrb[32].mxu0 }
 0xc75   : > { %v2895_v52 = vcombine.low %v2751_v47, %v2843_v40  ;;  %v2896_v53 = vcombine.high %v2751_v47, %v2843_v40  ;;  %v3723_v54 = vpop.f32.mrb[33].mxu0 }
 0xc76   : > { %v2846_v3 = vpop.f32.mrb[34].mxu0  ;;  %v3891_v54 = vld [vmem:[%s5012_s11] sm:$0xff]  }
 0xc77   : > { %v3724_v55 = vpop.f32.mrb[35].mxu0  ;;  %v2889_v56 = vpop.f32.mrb[40].mxu1  ;;  %v2903_v62 = vrot.slane %v2895_v52, %v4570_v19  ;;  %v2910_v63 = vrot.slane %v2896_v53, %v4570_v19  ;;  %v3889_v53 = vld [vmem:[%s5010_s9] sm:$0xff]   ;;  %v3892_v3 = vld [vmem:[%s5012_s11 + $0x8] sm:$0xff]  }
 0xc78   : > { %v2911_v57 = vcombine.low %v2797_v48, %v2889_v56  ;;  %v2912_v58 = vcombine.high %v2797_v48, %v2889_v56  ;;  %v3729_v59 = vpop.f32.mrb[41].mxu1  ;;  %3740 = vmatpush3.bf16.msra.mxu1 %v3889_v53 }
 0xc79   : > { %v2892_v60 = vpop.f32.mrb[42].mxu1  ;;  %3741 = vmatprep.subr.bf16.mxu1 %v4189_v0  ;;  %v3530_v59 = vld [vmem:[%s5016_s15] ss:$0 sm:$0xff] }
 0xc7a   : > { %v2919_v1 = vrot.slane %v2911_v57, %v4570_v19  ;;  %v2926_v2 = vrot.slane %v2912_v58, %v4570_v19  ;;  %v3730_v4 = vpop.f32.mrb[43].mxu1 }
 0xc7b   : > { %v3893_v4 = vld [vmem:[%s5012_s11 + $0x10] sm:$0xff]  }
 0xc7c   : > { %v2927_v6 = vcombine.low %v2903_v62, %v2919_v1  ;;  %v2928_v7 = vcombine.high %v2903_v62, %v2919_v1  ;;  %v2943_v8 = vcombine.low %v2910_v63, %v2926_v2  ;;  %v2944_v9 = vcombine.high %v2910_v63, %v2926_v2  ;;  %v3531_v62 = vld [vmem:[%s5017_s16] ss:$0 sm:$0xff] }
 0xc7e   : > { %v2935_v11 = vrot.slane %v2927_v6, %v4572_v26  ;;  %v2942_v13 = vrot.slane %v2928_v7, %v4572_v26  ;;  %v2951_v14 = vrot.slane %v2943_v8, %v4572_v26  ;;  %v2958_v15 = vrot.slane %v2944_v9, %v4572_v26  ;;  %v3894_v6 = vld [vmem:[%s5012_s11 + $0x18] sm:$0xff]   ;;  %v3532_v7 = vld [vmem:[%s5011_s10] ss:$0 sm:$0xff] }
 0xc80   : > { %v2963_v16 = vcombine.low %v2935_v11, %v2942_v13  ;;  %v3525_v17 = vcombine.high %v2935_v11, %v2942_v13  ;;  %v2979_v18 = vcombine.low %v2951_v14, %v2958_v15  ;;  %v3526_v20 = vcombine.high %v2951_v14, %v2958_v15 }
 0xc82   : > { %v2970_v22 = vrot.slane %v2963_v16, %v4570_v19  ;;  %v2978_v23 = vrot.slane %v3525_v17, %v4570_v19  ;;  %v2986_v24 = vrot.slane %v2979_v18, %v4570_v19  ;;  %v2994_v25 = vrot.slane %v3526_v20, %v4570_v19 }
 0xc84   : > { %v2996_v31 = vcombine.high %v2970_v22, %v2978_v23  ;;  %v3012_v32 = vcombine.high %v2986_v24, %v2994_v25  ;;  %v2995_v33 = vcombine.low %v2970_v22, %v2978_v23  ;;  %v3011_v34 = vcombine.low %v2986_v24, %v2994_v25 }
 0xc86   : > { %v3010_v35 = vrot.slane %v2996_v31, %v4572_v26  ;;  %v3026_v36 = vrot.slane %v3012_v32, %v4572_v26  ;;  %v3003_v27 = vrot.slane %v2995_v33, %v4572_v26  ;;  %v3019_v28 = vrot.slane %v3011_v34, %v4572_v26 }
 0xc88   : > { %v3029_v29 = vcombine.low %v3010_v35, %v3026_v36  ;;  %v3028_v30 = vcombine.high %v3003_v27, %v3019_v28  ;;  %v3030_v5 = vcombine.high %v3010_v35, %v3026_v36  ;;  %v3027_v41 = vcombine.low %v3003_v27, %v3019_v28 }
 0xc8a   : > { %3036 = vrot.lane.b32.xlu1 %v3029_v29, %s4204_s26  ;;  %3032 = vrot.lane.b32.xlu0 %v3028_v30, %s4205_s25  ;;  %v3543_v30 = vld [vmem:[%s5082_s2] ss:$0 sm:$0xff]  ;;  %s4101_s26 = scalar_lea.vmem %s4960_s19, 128  ;;  %s4107_s25 = scalar_lea.vmem %s4106_s5, 256 }
 0xc8b   : > { %p4102_p4 = scmp.ne.s32.totalorder %s4960_s19, %s4101_s26  ;;  %p4109_p0 = scmp.lt.s32.totalorder %s4107_s25, %s4101_s26 }
 0xc8d   : > { %p4103_p8 = pnand %p4102_p4, %p5084_p7  ;;  %p4110_p1 = por %p4109_p0, %p4108_p13 }
 0xc8e   : > { %3040 = vrot.lane.b32.xlu0 %v3030_v5, %s4206_s0  ;;  %s5081_s0 = sld [smem:[#allocation32_spill]] }
 0xc8f   : > { %p4104_p11 = pneg %p4103_p8 }
 0xc91   : > { %p4111_p6 = pnand %p4110_p1, %p4104_p11 }
 0xc94   : > { %v3542_v28 = vld [vmem:[%s5081_s0] ss:$0 sm:$0xff] }
 0xcfc   : > { %v3033_v19 = vpop.permute.xlu0 %3032  ;;  %v3037_v61 = vpop.permute.xlu1 %3036 }
 0xcfd   : > { %v3043_v42 = vsel %vm1231_vm2, %v3027_v41, %v3033_v19 }
 0xcfe   : > { %v3044_v44 = vsel %vm1806_vm4, %v3043_v42, %v3037_v61 }
 0xd00   : > { %v3041_v43 = vpop.permute.xlu0 %3040 }
 0xd01   : > { %v3045_v45 = vsel %vm1808_vm5, %v3044_v44, %v3041_v43 }
 0xd02   : > { %v3046_v26 = vpack.c.bf16 %v3045_v45, %v3045_v45 }
 0xd04   : > { %3736 = vmatmul.mubr.msk.bf16.vlgmr.msra.gmra.mrb[36].mxu0 %vm729_vm1, %v3046_v26 }
 0xd05   : > { %3755 = vmatprep.mubr.msk.bf16.mxu0 %vm4190_vm0, %v4189_v0  ;;  %3748 = vmatpush3.bf16.msra.mxu0 %v3891_v54 }
 0xd06   : > { %3749 = vmatprep.subr.bf16.mxu0 %v4189_v0 }
 0xd09   : > { %3750 = vmatpush3.bf16.msra.mxu0 %v3892_v3 }
 0xd0a   : > { %3751 = vmatprep.subr.bf16.mxu0 %v4189_v0 }
 0xd0d   : > { %3752 = vmatpush3.bf16.msra.mxu0 %v3893_v4 }
 0xd0e   : > { %3753 = vmatprep.subr.bf16.mxu0 %v4189_v0  ;;  %v3536_v0 = vld [vmem:[%s5013_s12] ss:$0 sm:$0xff] }
 0xd11   : > { %3754 = vmatpush3.bf16.msra.mxu0 %v3894_v6 }
 0xdd7   : > { %v3096_v46 = vpop.f32.mrb[36].mxu0 }
 0xdd8   : > { %v3102_v47 = vadd.f32 %v3096_v46, %v4748_v12  ;;  %v3737_v48 = vpop.f32.mrb[37].mxu0  ;;  %v3890_v12 = vld [vmem:[%s5010_s9 + $0x8] sm:$0xff]  }
 0xdd9   : > { %v3099_v49 = vpop.f32.mrb[38].mxu0  ;;  %3742 = vmatpush3.bf16.msra.mxu1 %v3890_v12 }
 0xdda   : > { %v3738_v50 = vpop.f32.mrb[39].mxu0  ;;  %v3103_v39 = vsel %vm729_vm1, %v3102_v47, 0.0 }
 0xddb   : > { %3104 = vadd.xlane.f32.xlu1 %v3103_v39 }
 0xe68   : > { %v3105_v37 = vpop.xlane.xlu1 %3104 }
 0xe69   : > { %v3106_v51 = vmul.f32 0.03125, %v3105_v37 }
 0xe6b   : > { %v3107_v38 = vsub.f32 %v3102_v47, %v3106_v51 }
 0xe6d   : > { %v3108_v40 = vmul.f32 %v3107_v38, %v3107_v38 }
 0xe6f   : > { %v3109_v52 = vsel %vm729_vm1, %v3108_v40, 0.0 }
 0xe70   : > { %3110 = vadd.xlane.f32.xlu0 %v3109_v52 }
 0xefd   : > { %v3111_v55 = vpop.xlane.xlu0 %3110 }
 0xefe   : > { %v3112_v56 = vmul.f32 0.03125, %v3111_v55 }
 0xf00   : > { %v3113_v57 = vadd.f32 1e-05, %v3112_v56 }
 0xf02   : > { %3929 = vrsqrt.f32 %v3113_v57 }
 0xf0c   : > { %v3930_v58 = vpop.eup %3929 }
 0xf0d   : > { %v3115_v60 = vmul.f32 %v3930_v58, %v3107_v38 }
 0xf0f   : > { %v3122_v63 = vmul.f32 %v3530_v59, %v3115_v60 }
 0xf11   : > { %v3129_v1 = vadd.f32 %v3531_v62, %v3122_v63 }
 0xf13   : > { %v3130_v2 = vpack.c.bf16 %v3129_v1, %v3129_v1 }
 0xf15   : > { %3744 = vmatmul.mubr.msk.bf16.vlgmr.msra.gmra.mrb[44].mxu1 %vm729_vm1, %v3130_v2 }
 0xfe8   : > { %v3190_v8 = vpop.f32.mrb[44].mxu1 }
 0xfe9   : > { %v3191_v9 = vadd.f32 %v3532_v7, %v3190_v8  ;;  %v3745_v10 = vpop.f32.mrb[45].mxu1 }
 0xfea   : > { %v3193_v11 = vpop.f32.mrb[46].mxu1 }
 0xfeb   : > { %v3196_v13 = vmax.f32 %v3191_v9, 0.0  ;;  %v3746_v14 = vpop.f32.mrb[47].mxu1 }
 0xfed   : > { %v3197_v15 = vpack.c.bf16 %v3196_v13, %v3196_v13 }
 0xfef   : > { %3756 = vmatmul.mubr.msk.bf16.vlgmr.msra.gmra.mrb[40].mxu0 %vm3236_vm6, %v3197_v15 }
0x10c2   : > { %v3274_v16 = vpop.f32.mrb[40].mxu0 }
0x10c3   : > { %v3275_v17 = vadd.f32 %v3536_v0, %v3274_v16  ;;  %v3757_v18 = vpop.f32.mrb[41].mxu0 }
0x10c4   : > { %v3277_v20 = vpop.f32.mrb[42].mxu0 }
0x10c5   : > { %v3758_v21 = vpop.f32.mrb[43].mxu0  ;;  %v3280_v22 = vadd.f32 %v3275_v17, %v3129_v1 }
0x10c7   : > { %v3281_v23 = vsel %vm729_vm1, %v3280_v22, 0.0 }
0x10c8   : > { %3282 = vadd.xlane.f32.xlu0 %v3281_v23 }
0x1155   : > { %v3283_v24 = vpop.xlane.xlu0 %3282 }
0x1156   : > { %v3284_v25 = vmul.f32 0.03125, %v3283_v24 }
0x1158   : > { %v3285_v31 = vsub.f32 %v3280_v22, %v3284_v25 }
0x115a   : > { %v3286_v32 = vmul.f32 %v3285_v31, %v3285_v31 }
0x115c   : > { %v3287_v33 = vsel %vm729_vm1, %v3286_v32, 0.0 }
0x115d   : > { %3288 = vadd.xlane.f32.xlu1 %v3287_v33 }
0x11ea   : > { %v3289_v34 = vpop.xlane.xlu1 %3288 }
0x11eb   : > { %v3290_v35 = vmul.f32 0.03125, %v3289_v34 }
0x11ed   : > { %v3291_v36 = vadd.f32 1e-05, %v3290_v35 }
0x11ef   : > { %3931 = vrsqrt.f32 %v3291_v36 }
0x11f9   : > { %v3932_v27 = vpop.eup %3931 }
0x11fa   : > { %v3293_v29 = vmul.f32 %v3932_v27, %v3285_v31 }
0x11fc   : > { %v3300_v5 = vmul.f32 %v3542_v28, %v3293_v29 }
0x11fe   : > { %v3307_v41 = vadd.f32 %v3543_v30, %v3300_v5 }
0x1200   : > { %3308 = vst.msk [vmem:[%s690_s27] sm:$0xff] %vm729_vm1, %v3307_v41 }
0x1201   : > { %4114 = shalt.err (!%p4111_p6)
}
0x1202   : > { %s4115_s28 = scalar_lea.hbm %s4958_s20, 128  ;;  %s4119_s18 = scalar_lea.hbm %s5083_s24, 256 }
0x1203   : > { %p4116_p5 = scmp.ne.s32.totalorder %s4958_s20, %s4115_s28  ;;  %p4120_p10 = scmp.lt.u32.totalorder %s4958_s20, %s5083_s24 }
0x1204   : > { %p4121_p2 = scmp.lt.u32.totalorder %s4119_s18, %s4115_s28  ;;  %p4123_p4 = scmp.lt.u32.totalorder %s4115_s28, %s4958_s20 }
0x1205   : > { %p4117_p9 = pnand %p4116_p5, %p5084_p7 }
0x1206   : > { %p4122_p3 = por %p4121_p2, %p4120_p10 }
0x1207   : > { %p4118_p12 = pneg %p4117_p9 }
0x1208   : > { %p4124_p8 = por %p4123_p4, %p4122_p3 }
0x120a   : > { %p4125_p11 = pnand %p4124_p8, %p4118_p12 }
0x120c   : > { %4128 = shalt.err (!%p4125_p11)
}
0x120d   : > { %3783 = dma.vmem_to_hbm [thread:$0]  (%p5084_p7), %s4960_s19, 128, %s4958_s20, %s3310_s3  }
0x120e PF: > { %s5085_s27 = sld [smem:[#allocation22_spill]]  ;;  %s5086_s29 = sld [smem:[#allocation19_spill]] }
0x120f   : > { %s5087_s21 = sld [smem:[#allocation26_spill]] }
0x1214   : > { %p3820_p13 = scmp.ge.s32.totalorder %s5085_s27, 2  ;;  %s3335_s26 = sand.u32 1, %s5086_s29  }
0x1215   : > { %p5088_p0 = scmp.ne.s32.totalorder %s5087_s21, 0  ;;  %s3336_s1 = scalar_lea.sflag [#allocation4], %s3335_s26 }
0x1217   : > { %p3805_p1 = pnand %p3820_p13, %p5088_p0 }
0x1219   : > { %4162 = dma.done.wait (!%p3805_p1), %s3336_s1, 128  }
0x121a   : > { %4164 = vsyncadd (!%p3805_p1), %s3336_s1, 4294967168  ;;  %s5089_s21 = sld [smem:[#allocation23_spill]]  ;;  %s5090_s0 = sld [smem:[#allocation20_spill]] }
0x121b   : > { %s5091_s30 = sld [smem:[#allocation21_spill]]  ;;  %s5092_s20 = sld [smem:[#allocation24_spill]] }
0x1220   : > { %p33_p6 = scmp.ge.s32.totalorder %s5089_s21, 4  }
0x1222   :  { %35 = sbr.rel (!%p33_p6) target bundleno = 16 (0x10), region = 159 }
0x1229   :  { %3341 = vsyncpa [#allocation3], 1 }
0x122a   :  { %3343 = vsyncpa [#allocation3 + $0x1], 1 }
0x122b   :  { %3344 = vsyncpa [#allocation6], 1 }
0x122c   :  { %3345 = vsyncpa [#allocation9], 1 }
0x122d   :  { %3346 = vsyncpa [#allocation12], 1 }
0x122e   :  { %3347 = vsyncpa [#allocation4], 1 }
0x122f   :  { %3349 = vsyncpa [#allocation4 + $0x1], 1 }

</bundles_post_ra>
